<compile_context>
chip_gen: v5e
topology: v5e:2x2
jax: 0.10.0
libtpu: 0.0.40
codegen_flags: <defaults>
</compile_context>

<pallas_src>
import jax
import jax.numpy as jnp
from jax import lax
from jax.experimental import pallas as pl
from jax.experimental.pallas import tpu as pltpu

HIDDEN_SIZE = 64
INPUT_SIZE = 28
OUTPUT_SIZE = 10


def _lstm_scan_kernel(xproj_ref, whh_ref, h_out_ref):
    """Runs the whole LSTM recurrence in one invocation.

    xproj_ref : (T, Bp, 4*Hp) f32   precomputed x @ W_ih + b, gate-lane-padded
    whh_ref   : (Hp, 4*Hp)    bf16  hidden->gates weights, padded
    h_out_ref : (Bp, Hp)      f32   last hidden state
    """
    T = xproj_ref.shape[0]
    Hp = h_out_ref.shape[1]

    # Loop-invariant weight read hoisted above the recurrence.
    whh = whh_ref[...]  # (Hp, 4*Hp) bf16

    def step(t, carry):
        h, c = carry
        # Single matmul on the sequential critical path (bf16 in, f32 acc).
        gates = (jnp.dot(h.astype(jnp.bfloat16), whh,
                         preferred_element_type=jnp.float32)
                 + xproj_ref[t])                       # (Bp, 4*Hp) f32
        # Gates are laid out at 128-lane boundaries -> unmasked slices.
        i_g = jax.nn.sigmoid(gates[:, 0 * Hp:1 * Hp])
        f_g = jax.nn.sigmoid(gates[:, 1 * Hp:2 * Hp])
        g_g = jnp.tanh(gates[:, 2 * Hp:3 * Hp])
        o_g = jax.nn.sigmoid(gates[:, 3 * Hp:4 * Hp])
        c_new = f_g * c + i_g * g_g
        h_new = o_g * jnp.tanh(c_new)
        return h_new, c_new

    h0 = jnp.zeros(h_out_ref.shape, jnp.float32)
    c0 = jnp.zeros(h_out_ref.shape, jnp.float32)
    h_last, _ = lax.fori_loop(0, T, step, (h0, c0), unroll=True)
    h_out_ref[...] = h_last


def rnn_forward(x, w_ih, w_hh, b_ih, b_hh, w_fc, b_fc):
    """x: (B, T, I) batch_first, PyTorch LSTM weight shapes:
    w_ih (4H, I), w_hh (4H, H), b_ih/b_hh (4H,), w_fc (O, H), b_fc (O,)."""
    B, T, I = x.shape
    H = w_hh.shape[1]
    O = w_fc.shape[0]
    Hp = 128   # lane-padded hidden size (per-gate width = one full lane tile)
    Bp = 8     # sublane-padded batch

    f32 = jnp.float32

    # ---- layout prep (wrapper / XLA side) ----
    # time-major, batch padded to native sublane count
    x_tm = jnp.transpose(x, (1, 0, 2)).astype(f32)                    # (T, B, I)
    x_p = jnp.zeros((T, Bp, I), f32).at[:, :B, :].set(x_tm)           # (T, Bp, I)

    def pad_gate_cols(w):
        # (rows, 4H) -> (rows, 4*Hp); gate k occupies lanes [k*Hp, k*Hp+H)
        rows = w.shape[0]
        w4 = w.reshape(rows, 4, H)
        return jnp.zeros((rows, 4, Hp), f32).at[:, :, :H].set(w4).reshape(rows, 4 * Hp)

    wih_p = pad_gate_cols(jnp.transpose(w_ih).astype(f32))            # (I, 4*Hp)
    b_p = pad_gate_cols((b_ih + b_hh).reshape(1, 4 * H).astype(f32))  # (1, 4*Hp)
    whh_p = jnp.zeros((Hp, 4 * Hp), f32).at[:H, :].set(
        pad_gate_cols(jnp.transpose(w_hh).astype(f32)))               # (Hp, 4*Hp)

    # Input projection hoisted off the recurrence: one well-shaped matmul.
    x_proj = (jnp.dot(x_p.reshape(T * Bp, I), wih_p,
                      preferred_element_type=f32) + b_p).reshape(T, Bp, 4 * Hp)

    whh_bf16 = whh_p.astype(jnp.bfloat16)

    h_last = pl.pallas_call(
        _lstm_scan_kernel,
        out_shape=jax.ShapeDtypeStruct((Bp, Hp), f32),
        grid_spec=pltpu.PrefetchScalarGridSpec(
            num_scalar_prefetch=0,
            grid=(1,),
            in_specs=[
                pl.BlockSpec((T, Bp, 4 * Hp), lambda i: (0, 0, 0)),   # x_proj
                pl.BlockSpec((Hp, 4 * Hp), lambda i: (0, 0)),         # W_hh (bf16)
            ],
            out_specs=pl.BlockSpec((Bp, Hp), lambda i: (0, 0)),       # h_last
        ),
        compiler_params=pltpu.CompilerParams(
            dimension_semantics=("arbitrary",)),
    )(x_proj, whh_bf16)

    # FC head in the wrapper (avoids a lane-sparse 10-wide kernel store).
    h = h_last[:B, :H]
    return h @ jnp.transpose(w_fc).astype(f32) + b_fc.astype(f32)


def _reference_forward(x, w_ih, w_hh, b_ih, b_hh, w_fc, b_fc):
    """Pure-JAX f32 reference with PyTorch LSTM semantics (gate order i,f,g,o)."""
    B, T, I = x.shape
    H = w_hh.shape[1]
    b = b_ih + b_hh

    def step(carry, x_t):
        h, c = carry
        gates = x_t @ w_ih.T + h @ w_hh.T + b
        i = jax.nn.sigmoid(gates[:, 0:H])
        f = jax.nn.sigmoid(gates[:, H:2 * H])
        g = jnp.tanh(gates[:, 2 * H:3 * H])
        o = jax.nn.sigmoid(gates[:, 3 * H:4 * H])
        c = f * c + i * g
        h = o * jnp.tanh(c)
        return (h, c), None

    h0 = jnp.zeros((B, H), jnp.float32)
    c0 = jnp.zeros((B, H), jnp.float32)
    (h_last, _), _ = lax.scan(step, (h0, c0), jnp.transpose(x, (1, 0, 2)))
    return h_last @ w_fc.T + b_fc


if __name__ == "__main__":
    key = jax.random.PRNGKey(0)
    B, T, I, H, O = 4, 8, INPUT_SIZE, HIDDEN_SIZE, OUTPUT_SIZE

    ks = jax.random.split(key, 8)
    bound = 1.0 / jnp.sqrt(H)
    # Deterministic parameter init mirroring PyTorch's uniform(-1/sqrt(H), 1/sqrt(H)).
    w_ih = jax.random.uniform(ks[0], (4 * H, I), jnp.float32, -bound, bound)
    w_hh = jax.random.uniform(ks[1], (4 * H, H), jnp.float32, -bound, bound)
    b_ih = jax.random.uniform(ks[2], (4 * H,), jnp.float32, -bound, bound)
    b_hh = jax.random.uniform(ks[3], (4 * H,), jnp.float32, -bound, bound)
    w_fc = jax.random.uniform(ks[4], (O, H), jnp.float32, -bound, bound)
    b_fc = jax.random.uniform(ks[5], (O,), jnp.float32, -bound, bound)

    x = jax.random.normal(ks[6], (B, T, I), jnp.float32)

    out = rnn_forward(x, w_ih, w_hh, b_ih, b_hh, w_fc, b_fc)
    out = jax.block_until_ready(out)

    ref = _reference_forward(x, w_ih, w_hh, b_ih, b_hh, w_fc, b_fc)
    assert out.shape == (B, O)
    # bf16 recurrent-matmul operands -> slightly looser tolerance vs f32 reference.
    assert jnp.allclose(out, ref, atol=2e-2, rtol=2e-2), "mismatch vs reference"

    print("KERNEL_OK")
</pallas_src>

<mosaic_0001>
module attributes {stable_mosaic.version = 11 : i64} {
  func.func @_lstm_scan_kernel(%arg0: i32, %arg1: memref<8x8x512xf32, #tpu.memory_space<vmem>>, %arg2: memref<128x512xbf16, #tpu.memory_space<vmem>>, %arg3: memref<8x128xf32, #tpu.memory_space<vmem>>) attributes {dimension_semantics = [#tpu.dimension_semantics<arbitrary>], iteration_bounds = array<i64: 1>, scalar_prefetch = 0 : i64, scratch_operands = 0 : i64, tpu.core_type = #tpu.core_type<tc>, window_params = [{pipeline_mode = #tpu.pipeline_mode<synchronous>, transform_indices = @transform_0, window_bounds = array<i64: 8, 8, 512>}, {pipeline_mode = #tpu.pipeline_mode<synchronous>, transform_indices = @transform_1, window_bounds = array<i64: 128, 512>}, {pipeline_mode = #tpu.pipeline_mode<synchronous>, transform_indices = @transform_2, window_bounds = array<i64: 8, 128>}]} {
    %c0 = arith.constant 0 : index
    %c0_0 = arith.constant 0 : index
    %0 = vector.load %arg2[%c0, %c0_0] : memref<128x512xbf16, #tpu.memory_space<vmem>>, vector<128x512xbf16>
    %cst = arith.constant 0.000000e+00 : f32
    %1 = vector.broadcast %cst : f32 to vector<8x128xf32>
    %cst_1 = arith.constant 0.000000e+00 : f32
    %2 = vector.broadcast %cst_1 : f32 to vector<8x128xf32>
    %c0_i32 = arith.constant 0 : i32
    %3 = arith.truncf %1 : vector<8x128xf32> to vector<8x128xbf16>
    %cst_2 = arith.constant dense<0.000000e+00> : vector<8x512xf32>
    %4 = tpu.matmul %3, %0, %cst_2 {dimension_numbers = #tpu.dot_dimension_numbers<[1], [0], [0], [1], [0, 0, 1, 1], [], []>} : vector<8x128xbf16>, vector<128x512xbf16>, vector<8x512xf32> -> vector<8x512xf32>
    %5 = arith.index_cast %c0_i32 : i32 to index
    %c0_3 = arith.constant 0 : index
    %c0_4 = arith.constant 0 : index
    %6 = vector.load %arg1[%5, %c0_3, %c0_4] : memref<8x8x512xf32, #tpu.memory_space<vmem>>, vector<1x8x512xf32>
    %7 = vector.shape_cast %6 : vector<1x8x512xf32> to vector<8x512xf32>
    %8 = arith.addf %4, %7 : vector<8x512xf32>
    %9 = vector.extract_strided_slice %8 {offsets = [0, 0], sizes = [8, 128], strides = [1, 1]} : vector<8x512xf32> to vector<8x128xf32>
    %10 = arith.negf %9 : vector<8x128xf32>
    %11 = math.exp %10 : vector<8x128xf32>
    %cst_5 = arith.constant 1.000000e+00 : f32
    %12 = vector.broadcast %cst_5 : f32 to vector<8x128xf32>
    %13 = arith.addf %12, %11 : vector<8x128xf32>
    %14 = arith.divf %12, %13 : vector<8x128xf32>
    %15 = vector.extract_strided_slice %8 {offsets = [0, 128], sizes = [8, 128], strides = [1, 1]} : vector<8x512xf32> to vector<8x128xf32>
    %16 = arith.negf %15 : vector<8x128xf32>
    %17 = math.exp %16 : vector<8x128xf32>
    %cst_6 = arith.constant 1.000000e+00 : f32
    %18 = vector.broadcast %cst_6 : f32 to vector<8x128xf32>
    %19 = arith.addf %18, %17 : vector<8x128xf32>
    %20 = arith.divf %18, %19 : vector<8x128xf32>
    %21 = vector.extract_strided_slice %8 {offsets = [0, 256], sizes = [8, 128], strides = [1, 1]} : vector<8x512xf32> to vector<8x128xf32>
    %22 = math.tanh %21 : vector<8x128xf32>
    %23 = vector.extract_strided_slice %8 {offsets = [0, 384], sizes = [8, 128], strides = [1, 1]} : vector<8x512xf32> to vector<8x128xf32>
    %24 = arith.negf %23 : vector<8x128xf32>
    %25 = math.exp %24 : vector<8x128xf32>
    %cst_7 = arith.constant 1.000000e+00 : f32
    %26 = vector.broadcast %cst_7 : f32 to vector<8x128xf32>
    %27 = arith.addf %26, %25 : vector<8x128xf32>
    %28 = arith.divf %26, %27 : vector<8x128xf32>
    %29 = arith.mulf %20, %2 : vector<8x128xf32>
    %30 = arith.mulf %14, %22 : vector<8x128xf32>
    %31 = arith.addf %29, %30 : vector<8x128xf32>
    %32 = math.tanh %31 : vector<8x128xf32>
    %33 = arith.mulf %28, %32 : vector<8x128xf32>
    %c1_i32 = arith.constant 1 : i32
    %34 = arith.truncf %33 : vector<8x128xf32> to vector<8x128xbf16>
    %cst_8 = arith.constant dense<0.000000e+00> : vector<8x512xf32>
    %35 = tpu.matmul %34, %0, %cst_8 {dimension_numbers = #tpu.dot_dimension_numbers<[1], [0], [0], [1], [0, 0, 1, 1], [], []>} : vector<8x128xbf16>, vector<128x512xbf16>, vector<8x512xf32> -> vector<8x512xf32>
    %36 = arith.index_cast %c1_i32 : i32 to index
    %c0_9 = arith.constant 0 : index
    %c0_10 = arith.constant 0 : index
    %37 = vector.load %arg1[%36, %c0_9, %c0_10] : memref<8x8x512xf32, #tpu.memory_space<vmem>>, vector<1x8x512xf32>
    %38 = vector.shape_cast %37 : vector<1x8x512xf32> to vector<8x512xf32>
    %39 = arith.addf %35, %38 : vector<8x512xf32>
    %40 = vector.extract_strided_slice %39 {offsets = [0, 0], sizes = [8, 128], strides = [1, 1]} : vector<8x512xf32> to vector<8x128xf32>
    %41 = arith.negf %40 : vector<8x128xf32>
    %42 = math.exp %41 : vector<8x128xf32>
    %cst_11 = arith.constant 1.000000e+00 : f32
    %43 = vector.broadcast %cst_11 : f32 to vector<8x128xf32>
    %44 = arith.addf %43, %42 : vector<8x128xf32>
    %45 = arith.divf %43, %44 : vector<8x128xf32>
    %46 = vector.extract_strided_slice %39 {offsets = [0, 128], sizes = [8, 128], strides = [1, 1]} : vector<8x512xf32> to vector<8x128xf32>
    %47 = arith.negf %46 : vector<8x128xf32>
    %48 = math.exp %47 : vector<8x128xf32>
    %cst_12 = arith.constant 1.000000e+00 : f32
    %49 = vector.broadcast %cst_12 : f32 to vector<8x128xf32>
    %50 = arith.addf %49, %48 : vector<8x128xf32>
    %51 = arith.divf %49, %50 : vector<8x128xf32>
    %52 = vector.extract_strided_slice %39 {offsets = [0, 256], sizes = [8, 128], strides = [1, 1]} : vector<8x512xf32> to vector<8x128xf32>
    %53 = math.tanh %52 : vector<8x128xf32>
    %54 = vector.extract_strided_slice %39 {offsets = [0, 384], sizes = [8, 128], strides = [1, 1]} : vector<8x512xf32> to vector<8x128xf32>
    %55 = arith.negf %54 : vector<8x128xf32>
    %56 = math.exp %55 : vector<8x128xf32>
    %cst_13 = arith.constant 1.000000e+00 : f32
    %57 = vector.broadcast %cst_13 : f32 to vector<8x128xf32>
    %58 = arith.addf %57, %56 : vector<8x128xf32>
    %59 = arith.divf %57, %58 : vector<8x128xf32>
    %60 = arith.mulf %51, %31 : vector<8x128xf32>
    %61 = arith.mulf %45, %53 : vector<8x128xf32>
    %62 = arith.addf %60, %61 : vector<8x128xf32>
    %63 = math.tanh %62 : vector<8x128xf32>
    %64 = arith.mulf %59, %63 : vector<8x128xf32>
    %c2_i32 = arith.constant 2 : i32
    %65 = arith.truncf %64 : vector<8x128xf32> to vector<8x128xbf16>
    %cst_14 = arith.constant dense<0.000000e+00> : vector<8x512xf32>
    %66 = tpu.matmul %65, %0, %cst_14 {dimension_numbers = #tpu.dot_dimension_numbers<[1], [0], [0], [1], [0, 0, 1, 1], [], []>} : vector<8x128xbf16>, vector<128x512xbf16>, vector<8x512xf32> -> vector<8x512xf32>
    %67 = arith.index_cast %c2_i32 : i32 to index
    %c0_15 = arith.constant 0 : index
    %c0_16 = arith.constant 0 : index
    %68 = vector.load %arg1[%67, %c0_15, %c0_16] : memref<8x8x512xf32, #tpu.memory_space<vmem>>, vector<1x8x512xf32>
    %69 = vector.shape_cast %68 : vector<1x8x512xf32> to vector<8x512xf32>
    %70 = arith.addf %66, %69 : vector<8x512xf32>
    %71 = vector.extract_strided_slice %70 {offsets = [0, 0], sizes = [8, 128], strides = [1, 1]} : vector<8x512xf32> to vector<8x128xf32>
    %72 = arith.negf %71 : vector<8x128xf32>
    %73 = math.exp %72 : vector<8x128xf32>
    %cst_17 = arith.constant 1.000000e+00 : f32
    %74 = vector.broadcast %cst_17 : f32 to vector<8x128xf32>
    %75 = arith.addf %74, %73 : vector<8x128xf32>
    %76 = arith.divf %74, %75 : vector<8x128xf32>
    %77 = vector.extract_strided_slice %70 {offsets = [0, 128], sizes = [8, 128], strides = [1, 1]} : vector<8x512xf32> to vector<8x128xf32>
    %78 = arith.negf %77 : vector<8x128xf32>
    %79 = math.exp %78 : vector<8x128xf32>
    %cst_18 = arith.constant 1.000000e+00 : f32
    %80 = vector.broadcast %cst_18 : f32 to vector<8x128xf32>
    %81 = arith.addf %80, %79 : vector<8x128xf32>
    %82 = arith.divf %80, %81 : vector<8x128xf32>
    %83 = vector.extract_strided_slice %70 {offsets = [0, 256], sizes = [8, 128], strides = [1, 1]} : vector<8x512xf32> to vector<8x128xf32>
    %84 = math.tanh %83 : vector<8x128xf32>
    %85 = vector.extract_strided_slice %70 {offsets = [0, 384], sizes = [8, 128], strides = [1, 1]} : vector<8x512xf32> to vector<8x128xf32>
    %86 = arith.negf %85 : vector<8x128xf32>
    %87 = math.exp %86 : vector<8x128xf32>
    %cst_19 = arith.constant 1.000000e+00 : f32
    %88 = vector.broadcast %cst_19 : f32 to vector<8x128xf32>
    %89 = arith.addf %88, %87 : vector<8x128xf32>
    %90 = arith.divf %88, %89 : vector<8x128xf32>
    %91 = arith.mulf %82, %62 : vector<8x128xf32>
    %92 = arith.mulf %76, %84 : vector<8x128xf32>
    %93 = arith.addf %91, %92 : vector<8x128xf32>
    %94 = math.tanh %93 : vector<8x128xf32>
    %95 = arith.mulf %90, %94 : vector<8x128xf32>
    %c3_i32 = arith.constant 3 : i32
    %96 = arith.truncf %95 : vector<8x128xf32> to vector<8x128xbf16>
    %cst_20 = arith.constant dense<0.000000e+00> : vector<8x512xf32>
    %97 = tpu.matmul %96, %0, %cst_20 {dimension_numbers = #tpu.dot_dimension_numbers<[1], [0], [0], [1], [0, 0, 1, 1], [], []>} : vector<8x128xbf16>, vector<128x512xbf16>, vector<8x512xf32> -> vector<8x512xf32>
    %98 = arith.index_cast %c3_i32 : i32 to index
    %c0_21 = arith.constant 0 : index
    %c0_22 = arith.constant 0 : index
    %99 = vector.load %arg1[%98, %c0_21, %c0_22] : memref<8x8x512xf32, #tpu.memory_space<vmem>>, vector<1x8x512xf32>
    %100 = vector.shape_cast %99 : vector<1x8x512xf32> to vector<8x512xf32>
    %101 = arith.addf %97, %100 : vector<8x512xf32>
    %102 = vector.extract_strided_slice %101 {offsets = [0, 0], sizes = [8, 128], strides = [1, 1]} : vector<8x512xf32> to vector<8x128xf32>
    %103 = arith.negf %102 : vector<8x128xf32>
    %104 = math.exp %103 : vector<8x128xf32>
    %cst_23 = arith.constant 1.000000e+00 : f32
    %105 = vector.broadcast %cst_23 : f32 to vector<8x128xf32>
    %106 = arith.addf %105, %104 : vector<8x128xf32>
    %107 = arith.divf %105, %106 : vector<8x128xf32>
    %108 = vector.extract_strided_slice %101 {offsets = [0, 128], sizes = [8, 128], strides = [1, 1]} : vector<8x512xf32> to vector<8x128xf32>
    %109 = arith.negf %108 : vector<8x128xf32>
    %110 = math.exp %109 : vector<8x128xf32>
    %cst_24 = arith.constant 1.000000e+00 : f32
    %111 = vector.broadcast %cst_24 : f32 to vector<8x128xf32>
    %112 = arith.addf %111, %110 : vector<8x128xf32>
    %113 = arith.divf %111, %112 : vector<8x128xf32>
    %114 = vector.extract_strided_slice %101 {offsets = [0, 256], sizes = [8, 128], strides = [1, 1]} : vector<8x512xf32> to vector<8x128xf32>
    %115 = math.tanh %114 : vector<8x128xf32>
    %116 = vector.extract_strided_slice %101 {offsets = [0, 384], sizes = [8, 128], strides = [1, 1]} : vector<8x512xf32> to vector<8x128xf32>
    %117 = arith.negf %116 : vector<8x128xf32>
    %118 = math.exp %117 : vector<8x128xf32>
    %cst_25 = arith.constant 1.000000e+00 : f32
    %119 = vector.broadcast %cst_25 : f32 to vector<8x128xf32>
    %120 = arith.addf %119, %118 : vector<8x128xf32>
    %121 = arith.divf %119, %120 : vector<8x128xf32>
    %122 = arith.mulf %113, %93 : vector<8x128xf32>
    %123 = arith.mulf %107, %115 : vector<8x128xf32>
    %124 = arith.addf %122, %123 : vector<8x128xf32>
    %125 = math.tanh %124 : vector<8x128xf32>
    %126 = arith.mulf %121, %125 : vector<8x128xf32>
    %c4_i32 = arith.constant 4 : i32
    %127 = arith.truncf %126 : vector<8x128xf32> to vector<8x128xbf16>
    %cst_26 = arith.constant dense<0.000000e+00> : vector<8x512xf32>
    %128 = tpu.matmul %127, %0, %cst_26 {dimension_numbers = #tpu.dot_dimension_numbers<[1], [0], [0], [1], [0, 0, 1, 1], [], []>} : vector<8x128xbf16>, vector<128x512xbf16>, vector<8x512xf32> -> vector<8x512xf32>
    %129 = arith.index_cast %c4_i32 : i32 to index
    %c0_27 = arith.constant 0 : index
    %c0_28 = arith.constant 0 : index
    %130 = vector.load %arg1[%129, %c0_27, %c0_28] : memref<8x8x512xf32, #tpu.memory_space<vmem>>, vector<1x8x512xf32>
    %131 = vector.shape_cast %130 : vector<1x8x512xf32> to vector<8x512xf32>
    %132 = arith.addf %128, %131 : vector<8x512xf32>
    %133 = vector.extract_strided_slice %132 {offsets = [0, 0], sizes = [8, 128], strides = [1, 1]} : vector<8x512xf32> to vector<8x128xf32>
    %134 = arith.negf %133 : vector<8x128xf32>
    %135 = math.exp %134 : vector<8x128xf32>
    %cst_29 = arith.constant 1.000000e+00 : f32
    %136 = vector.broadcast %cst_29 : f32 to vector<8x128xf32>
    %137 = arith.addf %136, %135 : vector<8x128xf32>
    %138 = arith.divf %136, %137 : vector<8x128xf32>
    %139 = vector.extract_strided_slice %132 {offsets = [0, 128], sizes = [8, 128], strides = [1, 1]} : vector<8x512xf32> to vector<8x128xf32>
    %140 = arith.negf %139 : vector<8x128xf32>
    %141 = math.exp %140 : vector<8x128xf32>
    %cst_30 = arith.constant 1.000000e+00 : f32
    %142 = vector.broadcast %cst_30 : f32 to vector<8x128xf32>
    %143 = arith.addf %142, %141 : vector<8x128xf32>
    %144 = arith.divf %142, %143 : vector<8x128xf32>
    %145 = vector.extract_strided_slice %132 {offsets = [0, 256], sizes = [8, 128], strides = [1, 1]} : vector<8x512xf32> to vector<8x128xf32>
    %146 = math.tanh %145 : vector<8x128xf32>
    %147 = vector.extract_strided_slice %132 {offsets = [0, 384], sizes = [8, 128], strides = [1, 1]} : vector<8x512xf32> to vector<8x128xf32>
    %148 = arith.negf %147 : vector<8x128xf32>
    %149 = math.exp %148 : vector<8x128xf32>
    %cst_31 = arith.constant 1.000000e+00 : f32
    %150 = vector.broadcast %cst_31 : f32 to vector<8x128xf32>
    %151 = arith.addf %150, %149 : vector<8x128xf32>
    %152 = arith.divf %150, %151 : vector<8x128xf32>
    %153 = arith.mulf %144, %124 : vector<8x128xf32>
    %154 = arith.mulf %138, %146 : vector<8x128xf32>
    %155 = arith.addf %153, %154 : vector<8x128xf32>
    %156 = math.tanh %155 : vector<8x128xf32>
    %157 = arith.mulf %152, %156 : vector<8x128xf32>
    %c5_i32 = arith.constant 5 : i32
    %158 = arith.truncf %157 : vector<8x128xf32> to vector<8x128xbf16>
    %cst_32 = arith.constant dense<0.000000e+00> : vector<8x512xf32>
    %159 = tpu.matmul %158, %0, %cst_32 {dimension_numbers = #tpu.dot_dimension_numbers<[1], [0], [0], [1], [0, 0, 1, 1], [], []>} : vector<8x128xbf16>, vector<128x512xbf16>, vector<8x512xf32> -> vector<8x512xf32>
    %160 = arith.index_cast %c5_i32 : i32 to index
    %c0_33 = arith.constant 0 : index
    %c0_34 = arith.constant 0 : index
    %161 = vector.load %arg1[%160, %c0_33, %c0_34] : memref<8x8x512xf32, #tpu.memory_space<vmem>>, vector<1x8x512xf32>
    %162 = vector.shape_cast %161 : vector<1x8x512xf32> to vector<8x512xf32>
    %163 = arith.addf %159, %162 : vector<8x512xf32>
    %164 = vector.extract_strided_slice %163 {offsets = [0, 0], sizes = [8, 128], strides = [1, 1]} : vector<8x512xf32> to vector<8x128xf32>
    %165 = arith.negf %164 : vector<8x128xf32>
    %166 = math.exp %165 : vector<8x128xf32>
    %cst_35 = arith.constant 1.000000e+00 : f32
    %167 = vector.broadcast %cst_35 : f32 to vector<8x128xf32>
    %168 = arith.addf %167, %166 : vector<8x128xf32>
    %169 = arith.divf %167, %168 : vector<8x128xf32>
    %170 = vector.extract_strided_slice %163 {offsets = [0, 128], sizes = [8, 128], strides = [1, 1]} : vector<8x512xf32> to vector<8x128xf32>
    %171 = arith.negf %170 : vector<8x128xf32>
    %172 = math.exp %171 : vector<8x128xf32>
    %cst_36 = arith.constant 1.000000e+00 : f32
    %173 = vector.broadcast %cst_36 : f32 to vector<8x128xf32>
    %174 = arith.addf %173, %172 : vector<8x128xf32>
    %175 = arith.divf %173, %174 : vector<8x128xf32>
    %176 = vector.extract_strided_slice %163 {offsets = [0, 256], sizes = [8, 128], strides = [1, 1]} : vector<8x512xf32> to vector<8x128xf32>
    %177 = math.tanh %176 : vector<8x128xf32>
    %178 = vector.extract_strided_slice %163 {offsets = [0, 384], sizes = [8, 128], strides = [1, 1]} : vector<8x512xf32> to vector<8x128xf32>
    %179 = arith.negf %178 : vector<8x128xf32>
    %180 = math.exp %179 : vector<8x128xf32>
    %cst_37 = arith.constant 1.000000e+00 : f32
    %181 = vector.broadcast %cst_37 : f32 to vector<8x128xf32>
    %182 = arith.addf %181, %180 : vector<8x128xf32>
    %183 = arith.divf %181, %182 : vector<8x128xf32>
    %184 = arith.mulf %175, %155 : vector<8x128xf32>
    %185 = arith.mulf %169, %177 : vector<8x128xf32>
    %186 = arith.addf %184, %185 : vector<8x128xf32>
    %187 = math.tanh %186 : vector<8x128xf32>
    %188 = arith.mulf %183, %187 : vector<8x128xf32>
    %c6_i32 = arith.constant 6 : i32
    %189 = arith.truncf %188 : vector<8x128xf32> to vector<8x128xbf16>
    %cst_38 = arith.constant dense<0.000000e+00> : vector<8x512xf32>
    %190 = tpu.matmul %189, %0, %cst_38 {dimension_numbers = #tpu.dot_dimension_numbers<[1], [0], [0], [1], [0, 0, 1, 1], [], []>} : vector<8x128xbf16>, vector<128x512xbf16>, vector<8x512xf32> -> vector<8x512xf32>
    %191 = arith.index_cast %c6_i32 : i32 to index
    %c0_39 = arith.constant 0 : index
    %c0_40 = arith.constant 0 : index
    %192 = vector.load %arg1[%191, %c0_39, %c0_40] : memref<8x8x512xf32, #tpu.memory_space<vmem>>, vector<1x8x512xf32>
    %193 = vector.shape_cast %192 : vector<1x8x512xf32> to vector<8x512xf32>
    %194 = arith.addf %190, %193 : vector<8x512xf32>
    %195 = vector.extract_strided_slice %194 {offsets = [0, 0], sizes = [8, 128], strides = [1, 1]} : vector<8x512xf32> to vector<8x128xf32>
    %196 = arith.negf %195 : vector<8x128xf32>
    %197 = math.exp %196 : vector<8x128xf32>
    %cst_41 = arith.constant 1.000000e+00 : f32
    %198 = vector.broadcast %cst_41 : f32 to vector<8x128xf32>
    %199 = arith.addf %198, %197 : vector<8x128xf32>
    %200 = arith.divf %198, %199 : vector<8x128xf32>
    %201 = vector.extract_strided_slice %194 {offsets = [0, 128], sizes = [8, 128], strides = [1, 1]} : vector<8x512xf32> to vector<8x128xf32>
    %202 = arith.negf %201 : vector<8x128xf32>
    %203 = math.exp %202 : vector<8x128xf32>
    %cst_42 = arith.constant 1.000000e+00 : f32
    %204 = vector.broadcast %cst_42 : f32 to vector<8x128xf32>
    %205 = arith.addf %204, %203 : vector<8x128xf32>
    %206 = arith.divf %204, %205 : vector<8x128xf32>
    %207 = vector.extract_strided_slice %194 {offsets = [0, 256], sizes = [8, 128], strides = [1, 1]} : vector<8x512xf32> to vector<8x128xf32>
    %208 = math.tanh %207 : vector<8x128xf32>
    %209 = vector.extract_strided_slice %194 {offsets = [0, 384], sizes = [8, 128], strides = [1, 1]} : vector<8x512xf32> to vector<8x128xf32>
    %210 = arith.negf %209 : vector<8x128xf32>
    %211 = math.exp %210 : vector<8x128xf32>
    %cst_43 = arith.constant 1.000000e+00 : f32
    %212 = vector.broadcast %cst_43 : f32 to vector<8x128xf32>
    %213 = arith.addf %212, %211 : vector<8x128xf32>
    %214 = arith.divf %212, %213 : vector<8x128xf32>
    %215 = arith.mulf %206, %186 : vector<8x128xf32>
    %216 = arith.mulf %200, %208 : vector<8x128xf32>
    %217 = arith.addf %215, %216 : vector<8x128xf32>
    %218 = math.tanh %217 : vector<8x128xf32>
    %219 = arith.mulf %214, %218 : vector<8x128xf32>
    %c7_i32 = arith.constant 7 : i32
    %220 = arith.truncf %219 : vector<8x128xf32> to vector<8x128xbf16>
    %cst_44 = arith.constant dense<0.000000e+00> : vector<8x512xf32>
    %221 = tpu.matmul %220, %0, %cst_44 {dimension_numbers = #tpu.dot_dimension_numbers<[1], [0], [0], [1], [0, 0, 1, 1], [], []>} : vector<8x128xbf16>, vector<128x512xbf16>, vector<8x512xf32> -> vector<8x512xf32>
    %222 = arith.index_cast %c7_i32 : i32 to index
    %c0_45 = arith.constant 0 : index
    %c0_46 = arith.constant 0 : index
    %223 = vector.load %arg1[%222, %c0_45, %c0_46] : memref<8x8x512xf32, #tpu.memory_space<vmem>>, vector<1x8x512xf32>
    %224 = vector.shape_cast %223 : vector<1x8x512xf32> to vector<8x512xf32>
    %225 = arith.addf %221, %224 : vector<8x512xf32>
    %226 = vector.extract_strided_slice %225 {offsets = [0, 0], sizes = [8, 128], strides = [1, 1]} : vector<8x512xf32> to vector<8x128xf32>
    %227 = arith.negf %226 : vector<8x128xf32>
    %228 = math.exp %227 : vector<8x128xf32>
    %cst_47 = arith.constant 1.000000e+00 : f32
    %229 = vector.broadcast %cst_47 : f32 to vector<8x128xf32>
    %230 = arith.addf %229, %228 : vector<8x128xf32>
    %231 = arith.divf %229, %230 : vector<8x128xf32>
    %232 = vector.extract_strided_slice %225 {offsets = [0, 128], sizes = [8, 128], strides = [1, 1]} : vector<8x512xf32> to vector<8x128xf32>
    %233 = arith.negf %232 : vector<8x128xf32>
    %234 = math.exp %233 : vector<8x128xf32>
    %cst_48 = arith.constant 1.000000e+00 : f32
    %235 = vector.broadcast %cst_48 : f32 to vector<8x128xf32>
    %236 = arith.addf %235, %234 : vector<8x128xf32>
    %237 = arith.divf %235, %236 : vector<8x128xf32>
    %238 = vector.extract_strided_slice %225 {offsets = [0, 256], sizes = [8, 128], strides = [1, 1]} : vector<8x512xf32> to vector<8x128xf32>
    %239 = math.tanh %238 : vector<8x128xf32>
    %240 = vector.extract_strided_slice %225 {offsets = [0, 384], sizes = [8, 128], strides = [1, 1]} : vector<8x512xf32> to vector<8x128xf32>
    %241 = arith.negf %240 : vector<8x128xf32>
    %242 = math.exp %241 : vector<8x128xf32>
    %cst_49 = arith.constant 1.000000e+00 : f32
    %243 = vector.broadcast %cst_49 : f32 to vector<8x128xf32>
    %244 = arith.addf %243, %242 : vector<8x128xf32>
    %245 = arith.divf %243, %244 : vector<8x128xf32>
    %246 = arith.mulf %237, %217 : vector<8x128xf32>
    %247 = arith.mulf %231, %239 : vector<8x128xf32>
    %248 = arith.addf %246, %247 : vector<8x128xf32>
    %249 = math.tanh %248 : vector<8x128xf32>
    %250 = arith.mulf %245, %249 : vector<8x128xf32>
    %c8_i32 = arith.constant 8 : i32
    %c0_50 = arith.constant 0 : index
    %c0_51 = arith.constant 0 : index
    %251 = vector.load %arg3[%c0_50, %c0_51] : memref<8x128xf32, #tpu.memory_space<vmem>>, vector<8x128xf32>
    tpu.vector_store %arg3[%c0_50, %c0_51], %250 {strides = array<i32>} : memref<8x128xf32, #tpu.memory_space<vmem>>, vector<8x128xf32>,
    return
  }
  func.func @transform_0(%arg0: i32) -> (i32, i32, i32) {
    %c0_i32 = arith.constant 0 : i32
    %c0_i32_0 = arith.constant 0 : i32
    %c0_i32_1 = arith.constant 0 : i32
    %c0_i32_2 = arith.constant 0 : i32
    return %c0_i32, %c0_i32_0, %c0_i32_1 : i32, i32, i32
  }
  func.func @transform_1(%arg0: i32) -> (i32, i32) {
    %c0_i32 = arith.constant 0 : i32
    %c0_i32_0 = arith.constant 0 : i32
    %c0_i32_1 = arith.constant 0 : i32
    return %c0_i32, %c0_i32_0 : i32, i32
  }
  func.func @transform_2(%arg0: i32) -> (i32, i32) {
    %c0_i32 = arith.constant 0 : i32
    %c0_i32_0 = arith.constant 0 : i32
    %c0_i32_1 = arith.constant 0 : i32
    return %c0_i32, %c0_i32_0 : i32, i32
  }
}

</mosaic_0001>

<bundles_post_ra>
// kernel: tpu_custom_call.1
= control target key start
LH: loop header
LB: loop body
LE: loop exit
PB: predicated region body
PF: predicated region fallthrough
CT: control target
= control target key end

     0   :  { %7 = vsyncpa [#allocation3], 0  ;;  %s2000_s0 = inlined_call_operand.hbm [shape: f32[8,8,512], index: 0, kind: input, shape index: {}]   ;;  %s2001_s1 = inlined_call_operand.hbm [shape: bf16[128,512], index: 1, kind: input, shape index: {}]   ;;  %s2002_s2 = inlined_call_operand.hbm [shape: f32[8,128], index: 2, kind: output, shape index: {}]  }
   0x1   :  { %8 = vsyncpa [#allocation6], 0 }
   0x2   :  { %9 = vsyncpa [#allocation4], 0  ;;  %s14_s11 = sshll.u32 %s2000_s0, 4  ;;  %s1620_s12 = smov [#allocation2]   ;;  %s15_s11 = int_to_ptr.hbm [resolvable:$true] %s14_s11 }
   0x3   :  { %s16_s13 = sshll.u32 %s1620_s12, 4  ;;  %s27_s16 = sshll.u32 %s2001_s1, 4  ;;  %s17_s13 = int_to_ptr.vmem [resolvable:$true] %s16_s13  ;;  %s28_s16 = int_to_ptr.hbm [resolvable:$true] %s27_s16 }
   0x4   :  { %s1621_s17 = smov 512   ;;  %s1622_s18 = smov 32  }
   0x5   :  { %22 = dma.hbm_to_vmem [thread:$0]  %s15_s11, 4096, %s17_s13, [#allocation3], %s1621_s17, %s1621_s17, %s1622_s18  }
   0x6   :  { %s1623_s19 = smov [#allocation5]   ;;  %s1624_s21 = smov 256  }
   0x7   :  { %s29_s20 = sshll.u32 %s1623_s19, 4  ;;  %s1625_s22 = smov 16   ;;  %s30_s20 = int_to_ptr.vmem [resolvable:$true] %s29_s20 }
   0x8   :  { %35 = dma.hbm_to_vmem [thread:$0]  %s28_s16, 4096, %s30_s20, [#allocation6], %s1624_s21, %s1624_s21, %s1625_s22  }
   0x9   :  { %1614 = dma.done.wait [#allocation3], 4096  }
   0xa   :  { %1615 = vsyncadd [#allocation3], 4294963200 }
   0xb   :  { %1616 = dma.done.wait [#allocation6], 4096  }
   0xc   :  { %1617 = vsyncadd [#allocation6], 4294963200  ;;  %v1336_v0 = vld [vmem:[#allocation5 + $0xe0] sm:$0xf]  ;;  %v1404_v1 = vld [vmem:[#allocation5 + $0xec] sm:$0xf0] }
   0xd   :  { %v1402_v2 = vld [vmem:[#allocation5 + $0xe4] sm:$0xf]  ;;  %v1649_v3 = vor.u32 %v1404_v1, %v1336_v0  ;;  %v1338_v4 = vld [vmem:[#allocation5 + $0xf0] sm:$0xf0]  ;;  %v1403_v5 = vld [vmem:[#allocation5 + $0xec] sm:$0xf] }
   0xe   :  { %v1346_v6 = vld [vmem:[#allocation5 + $0xf8] sm:$0xf0]  ;;  %v1651_v7 = vor.u32 %v1402_v2, %v1338_v4  ;;  %v1320_v9 = vld [vmem:[#allocation5 + $0xc0] sm:$0xf]  ;;  %v1400_v10 = vld [vmem:[#allocation5 + $0xcc] sm:$0xf0] }
   0xf   :  { %v1653_v8 = vor.u32 %v1403_v5, %v1346_v6  ;;  %v1398_v11 = vld [vmem:[#allocation5 + $0xc4] sm:$0xf]  ;;  %241 = vmatpush.bf16.msra.mxu0 %v1649_v3  ;;  %v1656_v12 = vor.u32 %v1400_v10, %v1320_v9  ;;  %v1322_v13 = vld [vmem:[#allocation5 + $0xd0] sm:$0xf0]  ;;  %v1399_v14 = vld [vmem:[#allocation5 + $0xcc] sm:$0xf] }
  0x10   :  { %v1330_v15 = vld [vmem:[#allocation5 + $0xd8] sm:$0xf0]  ;;  %254 = vmatpush.bf16.msra.mxu1 %v1651_v7  ;;  %v1660_v16 = vor.u32 %v1398_v11, %v1322_v13  ;;  %v1344_v18 = vld [vmem:[#allocation5 + $0xe8] sm:$0xf]  ;;  %v1405_v19 = vld [vmem:[#allocation5 + $0xf4] sm:$0xf0] }
  0x11   :  { %280 = vmatpush.bf16.msra.mxu3 %v1653_v8  ;;  %v1662_v17 = vor.u32 %v1399_v14, %v1330_v15  ;;  %v1304_v20 = vld [vmem:[#allocation5 + $0xa0] sm:$0xf]  ;;  %v1664_v21 = vor.u32 %v1405_v19, %v1344_v18  ;;  %v1396_v22 = vld [vmem:[#allocation5 + $0xac] sm:$0xf0]  ;;  %v1394_v23 = vld [vmem:[#allocation5 + $0xa4] sm:$0xf] }
  0x12   :  { %v1306_v24 = vld [vmem:[#allocation5 + $0xb0] sm:$0xf0]  ;;  %v1395_v25 = vld [vmem:[#allocation5 + $0xac] sm:$0xf]  ;;  %v1314_v26 = vld [vmem:[#allocation5 + $0xb8] sm:$0xf0]  ;;  %v1668_v28 = vor.u32 %v1396_v22, %v1304_v20 }
  0x13   :  { %v1328_v27 = vld [vmem:[#allocation5 + $0xc8] sm:$0xf]  ;;  %242 = vmatpush.bf16.msra.mxu0 %v1656_v12  ;;  %267 = vmatpush.bf16.msra.mxu2 %v1664_v21  ;;  %v1401_v29 = vld [vmem:[#allocation5 + $0xd4] sm:$0xf0]  ;;  %v1288_v30 = vld [vmem:[#allocation5 + $0x80] sm:$0xf]  ;;  %v1672_v32 = vor.u32 %v1394_v23, %v1306_v24  ;;  %v1674_v33 = vor.u32 %v1395_v25, %v1314_v26 }
  0x14   :  { %v1392_v31 = vld [vmem:[#allocation5 + $0x8c] sm:$0xf0]  ;;  %255 = vmatpush.bf16.msra.mxu1 %v1660_v16  ;;  %v1676_v34 = vor.u32 %v1401_v29, %v1328_v27  ;;  %v1390_v35 = vld [vmem:[#allocation5 + $0x84] sm:$0xf]  ;;  %v1290_v36 = vld [vmem:[#allocation5 + $0x90] sm:$0xf0] }
  0x15   :  { %281 = vmatpush.bf16.msra.mxu3 %v1662_v17  ;;  %v1391_v37 = vld [vmem:[#allocation5 + $0x8c] sm:$0xf]  ;;  %v1298_v38 = vld [vmem:[#allocation5 + $0x98] sm:$0xf0]  ;;  %v1312_v39 = vld [vmem:[#allocation5 + $0xa8] sm:$0xf]  ;;  %v1680_v41 = vor.u32 %v1392_v31, %v1288_v30  ;;  %v1686_v45 = vor.u32 %v1390_v35, %v1290_v36 }
  0x16   :  { %v1397_v40 = vld [vmem:[#allocation5 + $0xb4] sm:$0xf0]  ;;  %v1272_v43 = vld [vmem:[#allocation5 + $0x60] sm:$0xf]  ;;  %v1388_v44 = vld [vmem:[#allocation5 + $0x6c] sm:$0xf0]  ;;  %v1688_v46 = vor.u32 %v1391_v37, %v1298_v38 }
  0x17   :  { %243 = vmatpush.bf16.msra.mxu0 %v1668_v28  ;;  %268 = vmatpush.bf16.msra.mxu2 %v1676_v34  ;;  %v1682_v42 = vor.u32 %v1397_v40, %v1312_v39  ;;  %v1386_v47 = vld [vmem:[#allocation5 + $0x64] sm:$0xf]  ;;  %v1296_v48 = vld [vmem:[#allocation5 + $0x88] sm:$0xf]  ;;  %v1393_v49 = vld [vmem:[#allocation5 + $0x94] sm:$0xf0]  ;;  %v1692_v53 = vor.u32 %v1388_v44, %v1272_v43 }
  0x18   :  { %256 = vmatpush.bf16.msra.mxu1 %v1672_v32  ;;  %v1274_v50 = vld [vmem:[#allocation5 + $0x70] sm:$0xf0]  ;;  %v1387_v51 = vld [vmem:[#allocation5 + $0x6c] sm:$0xf]  ;;  %v1282_v52 = vld [vmem:[#allocation5 + $0x78] sm:$0xf0]  ;;  %v1694_v54 = vor.u32 %v1393_v49, %v1296_v48 }
  0x19   :  { %282 = vmatpush.bf16.msra.mxu3 %v1674_v33  ;;  %v1256_v55 = vld [vmem:[#allocation5 + $0x40] sm:$0xf]  ;;  %v1384_v56 = vld [vmem:[#allocation5 + $0x4c] sm:$0xf0]  ;;  %v1698_v57 = vor.u32 %v1386_v47, %v1274_v50  ;;  %v1700_v58 = vor.u32 %v1387_v51, %v1282_v52  ;;  %v1382_v59 = vld [vmem:[#allocation5 + $0x44] sm:$0xf] }
  0x1a   :  { %v1280_v60 = vld [vmem:[#allocation5 + $0x68] sm:$0xf]  ;;  %v1389_v61 = vld [vmem:[#allocation5 + $0x74] sm:$0xf0]  ;;  %v1258_v62 = vld [vmem:[#allocation5 + $0x50] sm:$0xf0]  ;;  %v1704_v1 = vor.u32 %v1384_v56, %v1256_v55 }
  0x1b   :  { %244 = vmatpush.bf16.msra.mxu0 %v1680_v41  ;;  %269 = vmatpush.bf16.msra.mxu2 %v1682_v42  ;;  %v1383_v63 = vld [vmem:[#allocation5 + $0x4c] sm:$0xf]  ;;  %v1266_v0 = vld [vmem:[#allocation5 + $0x58] sm:$0xf0]  ;;  %v1706_v2 = vor.u32 %v1389_v61, %v1280_v60  ;;  %v1240_v4 = vld [vmem:[#allocation5 + $0x20] sm:$0xf]  ;;  %v1710_v6 = vor.u32 %v1382_v59, %v1258_v62 }
  0x1c   :  { %257 = vmatpush.bf16.msra.mxu1 %v1686_v45  ;;  %v1380_v5 = vld [vmem:[#allocation5 + $0x2c] sm:$0xf0]  ;;  %v1712_v9 = vor.u32 %v1383_v63, %v1266_v0  ;;  %v1378_v10 = vld [vmem:[#allocation5 + $0x24] sm:$0xf]  ;;  %v1264_v11 = vld [vmem:[#allocation5 + $0x48] sm:$0xf] }
  0x1d   :  { %283 = vmatpush.bf16.msra.mxu3 %v1688_v46  ;;  %v1385_v13 = vld [vmem:[#allocation5 + $0x54] sm:$0xf0]  ;;  %v1242_v14 = vld [vmem:[#allocation5 + $0x30] sm:$0xf0]  ;;  %v1379_v15 = vld [vmem:[#allocation5 + $0x2c] sm:$0xf]  ;;  %v1716_v19 = vor.u32 %v1380_v5, %v1240_v4 }
  0x1e   :  { %v1250_v18 = vld [vmem:[#allocation5 + $0x38] sm:$0xf0]  ;;  %v1718_v20 = vor.u32 %v1385_v13, %v1264_v11  ;;  %v1224_v22 = vld [vmem:[#allocation5] sm:$0xf]  ;;  %v1376_v23 = vld [vmem:[#allocation5 + $0xc] sm:$0xf0]  ;;  %v1722_v24 = vor.u32 %v1378_v10, %v1242_v14 }
  0x1f   :  { %245 = vmatpush.bf16.msra.mxu0 %v1692_v53  ;;  %270 = vmatpush.bf16.msra.mxu2 %v1694_v54  ;;  %v1724_v25 = vor.u32 %v1379_v15, %v1250_v18  ;;  %v1374_v26 = vld [vmem:[#allocation5 + $0x4] sm:$0xf]  ;;  %v1248_v27 = vld [vmem:[#allocation5 + $0x28] sm:$0xf]  ;;  %v1381_v29 = vld [vmem:[#allocation5 + $0x34] sm:$0xf0]  ;;  %v1728_v36 = vor.u32 %v1376_v23, %v1224_v22 }
  0x20   :  { %258 = vmatpush.bf16.msra.mxu1 %v1698_v57  ;;  %v1226_v30 = vld [vmem:[#allocation5 + $0x10] sm:$0xf0]  ;;  %v1375_v31 = vld [vmem:[#allocation5 + $0xc] sm:$0xf]  ;;  %v1234_v35 = vld [vmem:[#allocation5 + $0x18] sm:$0xf0]  ;;  %v1730_v37 = vor.u32 %v1381_v29, %v1248_v27 }
  0x21   :  { %284 = vmatpush.bf16.msra.mxu3 %v1700_v58  ;;  %v1734_v38 = vor.u32 %v1374_v26, %v1226_v30  ;;  %v1736_v39 = vor.u32 %v1375_v31, %v1234_v35  ;;  %v1232_v40 = vld [vmem:[#allocation5 + $0x8] sm:$0xf]  ;;  %v1377_v43 = vld [vmem:[#allocation5 + $0x14] sm:$0xf0]  ;;  %v1626_v47 = vmov 0   ;;  %v77_v48 = vld [vmem:[#allocation2] sm:$0xff] }
  0x22   :  { %v1742_v44 = vor.u32 %v1377_v43, %v1232_v40  ;;  %v78_v49 = vld [vmem:[#allocation2 + $0x8] sm:$0xff]  ;;  %v80_v60 = vld [vmem:[#allocation2 + $0x18] sm:$0xff]  ;;  %v79_v15 = vld [vmem:[#allocation2 + $0x10] sm:$0xff]  ;;  %s1627_s0 = smov [#allocation7]   ;;  %s1211_s25 = sshll.u32 %s2002_s2, 4  ;;  %s1212_s25 = int_to_ptr.hbm [resolvable:$true] %s1211_s25 }
  0x23   :  { %246 = vmatpush.bf16.msra.mxu0 %v1704_v1  ;;  %271 = vmatpush.bf16.msra.mxu2 %v1706_v2  ;;  %s1209_s1 = sshll.u32 %s1627_s0, 4  ;;  %s1210_s1 = int_to_ptr.vmem [resolvable:$true] %s1209_s1 }
  0x24   :  { %259 = vmatpush.bf16.msra.mxu1 %v1710_v6 }
  0x25   :  { %285 = vmatpush.bf16.msra.mxu3 %v1712_v9 }
  0x27   :  { %247 = vmatpush.bf16.msra.mxu0 %v1716_v19  ;;  %272 = vmatpush.bf16.msra.mxu2 %v1718_v20 }
  0x28   :  { %260 = vmatpush.bf16.msra.mxu1 %v1722_v24 }
  0x29   :  { %286 = vmatpush.bf16.msra.mxu3 %v1724_v25 }
  0x2b   :  { %248 = vmatpush.bf16.msra.mxu0 %v1728_v36  ;;  %273 = vmatpush.bf16.msra.mxu2 %v1730_v37 }
  0x2c   :  { %261 = vmatpush.bf16.msra.mxu1 %v1734_v38 }
  0x2d   :  { %287 = vmatpush.bf16.msra.mxu3 %v1736_v39 }
  0x2e   :  { %249 = vmatmul.bf16.vlgmr.msra.gmra.mxu0 %v1626_v47 }
  0x2f   :  { %362 = vmatpush.bf16.msrb.mxu0 %v1649_v3  ;;  %262 = vmatmul.bf16.vlgmr.msra.gmra.mxu1 %v1626_v47 }
  0x30   :  { %375 = vmatpush.bf16.msrb.mxu1 %v1651_v7  ;;  %288 = vmatmul.bf16.vlgmr.msra.gmra.mxu3 %v1626_v47 }
  0x31   :  { %401 = vmatpush.bf16.msrb.mxu3 %v1653_v8  ;;  %274 = vmatpush.bf16.msra.mxu2 %v1742_v44 }
  0x33   :  { %363 = vmatpush.bf16.msrb.mxu0 %v1656_v12 }
  0x34   :  { %376 = vmatpush.bf16.msrb.mxu1 %v1660_v16  ;;  %275 = vmatmul.bf16.vlgmr.msra.gmra.mxu2 %v1626_v47 }
  0x35   :  { %388 = vmatpush.bf16.msrb.mxu2 %v1664_v21  ;;  %402 = vmatpush.bf16.msrb.mxu3 %v1662_v17 }
  0x37   :  { %364 = vmatpush.bf16.msrb.mxu0 %v1668_v28 }
  0x38   :  { %377 = vmatpush.bf16.msrb.mxu1 %v1672_v32 }
  0x39   :  { %389 = vmatpush.bf16.msrb.mxu2 %v1676_v34  ;;  %403 = vmatpush.bf16.msrb.mxu3 %v1674_v33 }
  0x3b   :  { %365 = vmatpush.bf16.msrb.mxu0 %v1680_v41 }
  0x3c   :  { %378 = vmatpush.bf16.msrb.mxu1 %v1686_v45 }
  0x3d   :  { %390 = vmatpush.bf16.msrb.mxu2 %v1682_v42  ;;  %404 = vmatpush.bf16.msrb.mxu3 %v1688_v46 }
  0x3f   :  { %366 = vmatpush.bf16.msrb.mxu0 %v1692_v53 }
  0x40   :  { %379 = vmatpush.bf16.msrb.mxu1 %v1698_v57 }
  0x41   :  { %391 = vmatpush.bf16.msrb.mxu2 %v1694_v54  ;;  %405 = vmatpush.bf16.msrb.mxu3 %v1700_v58 }
  0x43   :  { %367 = vmatpush.bf16.msrb.mxu0 %v1704_v1 }
  0x44   :  { %380 = vmatpush.bf16.msrb.mxu1 %v1710_v6 }
  0x45   :  { %392 = vmatpush.bf16.msrb.mxu2 %v1706_v2  ;;  %406 = vmatpush.bf16.msrb.mxu3 %v1712_v9 }
  0x47   :  { %368 = vmatpush.bf16.msrb.mxu0 %v1716_v19 }
  0x48   :  { %381 = vmatpush.bf16.msrb.mxu1 %v1722_v24 }
  0x49   :  { %393 = vmatpush.bf16.msrb.mxu2 %v1718_v20  ;;  %407 = vmatpush.bf16.msrb.mxu3 %v1724_v25 }
  0x4b   :  { %369 = vmatpush.bf16.msrb.mxu0 %v1728_v36 }
  0x4c   :  { %382 = vmatpush.bf16.msrb.mxu1 %v1734_v38 }
  0x4d   :  { %394 = vmatpush.bf16.msrb.mxu2 %v1730_v37  ;;  %408 = vmatpush.bf16.msrb.mxu3 %v1736_v39 }
  0x4f   :  { %483 = vmatpush.bf16.msra.mxu0 %v1649_v3 }
  0x50   :  { %496 = vmatpush.bf16.msra.mxu1 %v1651_v7 }
  0x51   :  { %522 = vmatpush.bf16.msra.mxu3 %v1653_v8  ;;  %395 = vmatpush.bf16.msrb.mxu2 %v1742_v44 }
  0x53   :  { %484 = vmatpush.bf16.msra.mxu0 %v1656_v12 }
  0x54   :  { %497 = vmatpush.bf16.msra.mxu1 %v1660_v16 }
  0x55   :  { %509 = vmatpush.bf16.msra.mxu2 %v1664_v21  ;;  %523 = vmatpush.bf16.msra.mxu3 %v1662_v17 }
  0x57   :  { %485 = vmatpush.bf16.msra.mxu0 %v1668_v28 }
  0x58   :  { %498 = vmatpush.bf16.msra.mxu1 %v1672_v32 }
  0x59   :  { %510 = vmatpush.bf16.msra.mxu2 %v1676_v34  ;;  %524 = vmatpush.bf16.msra.mxu3 %v1674_v33 }
  0x5b   :  { %486 = vmatpush.bf16.msra.mxu0 %v1680_v41 }
  0x5c   :  { %499 = vmatpush.bf16.msra.mxu1 %v1686_v45 }
  0x5d   :  { %511 = vmatpush.bf16.msra.mxu2 %v1682_v42  ;;  %525 = vmatpush.bf16.msra.mxu3 %v1688_v46 }
  0x5f   :  { %487 = vmatpush.bf16.msra.mxu0 %v1692_v53 }
  0x60   :  { %500 = vmatpush.bf16.msra.mxu1 %v1698_v57 }
  0x61   :  { %512 = vmatpush.bf16.msra.mxu2 %v1694_v54  ;;  %526 = vmatpush.bf16.msra.mxu3 %v1700_v58 }
  0x63   :  { %488 = vmatpush.bf16.msra.mxu0 %v1704_v1 }
  0x64   :  { %501 = vmatpush.bf16.msra.mxu1 %v1710_v6 }
  0x65   :  { %513 = vmatpush.bf16.msra.mxu2 %v1706_v2  ;;  %527 = vmatpush.bf16.msra.mxu3 %v1712_v9 }
  0x67   :  { %489 = vmatpush.bf16.msra.mxu0 %v1716_v19 }
  0x68   :  { %502 = vmatpush.bf16.msra.mxu1 %v1722_v24 }
  0x69   :  { %514 = vmatpush.bf16.msra.mxu2 %v1718_v20  ;;  %528 = vmatpush.bf16.msra.mxu3 %v1724_v25 }
  0x6b   :  { %490 = vmatpush.bf16.msra.mxu0 %v1728_v36 }
  0x6c   :  { %503 = vmatpush.bf16.msra.mxu1 %v1734_v38 }
  0x6d   :  { %515 = vmatpush.bf16.msra.mxu2 %v1730_v37  ;;  %529 = vmatpush.bf16.msra.mxu3 %v1736_v39 }
  0x71   :  { %516 = vmatpush.bf16.msra.mxu2 %v1742_v44 }
  0xab   :  { %v250_v50 = vpop.f32.mrf.mxu0 }
  0xac   :  { %v251_v51 = vadd.f32 %v250_v50, %v77_v48  ;;  %v263_v52 = vpop.f32.mrf.mxu1 }
  0xad   :  { %v264_v55 = vadd.f32 %v263_v52, %v78_v49 }
  0xae   :  { %v1350_v56 = vmul.f32 -1.442695, %v251_v51 }
  0xaf   :  { %v1351_v59 = vmul.f32 -1.442695, %v264_v55 }
  0xb0   :  { %1414 = vpow2.f32 %v1350_v56 }
  0xb1   :  { %1416 = vpow2.f32 %v1351_v59 }
  0xb3   :  { %v289_v61 = vpop.f32.mrf.mxu3  ;;  %v252_v63 = vpop.f32.mrf.mxu0 }
  0xb4   :  { %v290_v62 = vadd.f32 %v289_v61, %v80_v60  ;;  %v265_v0 = vpop.f32.mrf.mxu1 }
  0xb6   :  { %v1352_v4 = vmul.f32 -1.442695, %v290_v62  ;;  %v1415_v5 = vpop.eup %1414 }
  0xb7   :  { %v276_v10 = vpop.f32.mrf.mxu2  ;;  %v1417_v11 = vpop.eup %1416  ;;  %v296_v13 = vadd.f32 1.0, %v1415_v5 }
  0xb8   :  { %1418 = vpow2.f32 %v1352_v4  ;;  %v315_v14 = vadd.f32 1.0, %v1417_v11  ;;  %v277_v23 = vadd.f32 %v276_v10, %v79_v15 }
  0xb9   :  { %1420 = vrcp.f32 %v296_v13  ;;  %v308_v47 = vand.u32 2147483648, %v296_v13  ;;  %v306_v50 = vand.u32 2147483647, %v296_v13  ;;  %vm302_vm2 = vweird.f32 %v296_v13 }
  0xba   :  { %1422 = vrcp.f32 %v315_v14  ;;  %v327_v48 = vand.u32 2147483648, %v315_v14  ;;  %v325_v52 = vand.u32 2147483647, %v315_v14  ;;  %vm321_vm3 = vweird.f32 %v315_v14 }
  0xbb   :  { %v291_v18 = vpop.f32.mrf.mxu3  ;;  %v309_v61 = vor.u32 1.1754944e-38, %v308_v47  ;;  %vm307_vm5 = vcmp.eq.f32.partialorder %v306_v50, 8.507059e+37  ;;  %v359_v47 = vld [vmem:[#allocation2 + $0x28] sm:$0xff] }
  0xbc   :  { %v328_v63 = vor.u32 1.1754944e-38, %v327_v48  ;;  %vm326_vm7 = vcmp.eq.f32.partialorder %v325_v52, 8.507059e+37 }
  0xbe   :  { %v1419_v22 = vpop.eup %1418 }
  0xbf   :  { %v335_v26 = vadd.f32 1.0, %v1419_v22  ;;  %v278_v27 = vpop.f32.mrf.mxu2  ;;  %v1421_v29 = vpop.eup %1420 }
  0xc0   :  { %v1423_v30 = vpop.eup %1422  ;;  %v298_v31 = vmul.f32 %v1421_v29, %v296_v13  ;;  %vm303_vm0 = vweird.f32 %v1421_v29 }
  0xc1   :  { %1424 = vrcp.f32 %v335_v26  ;;  %v317_v35 = vmul.f32 %v1423_v30, %v315_v14  ;;  %vm322_vm1 = vweird.f32 %v1423_v30  ;;  %vm304_vm4 = vmor %vm302_vm2, %vm303_vm0  ;;  %v347_v14 = vand.u32 2147483648, %v335_v26 }
  0xc2   :  { %1426 = vtanh.f32 %v277_v23  ;;  %v299_v40 = vsub.f32 1.0, %v298_v31  ;;  %vm323_vm6 = vmor %vm321_vm3, %vm322_vm1  ;;  %vm341_vm9 = vweird.f32 %v335_v26  ;;  %v345_v27 = vand.u32 2147483647, %v335_v26 }
  0xc3   :  { %v318_v43 = vsub.f32 1.0, %v317_v35  ;;  %v348_v31 = vor.u32 1.1754944e-38, %v347_v14 }
  0xc4   :  { %v300_v49 = vmul.f32 %v1421_v29, %v299_v40  ;;  %vm346_vm11 = vcmp.eq.f32.partialorder %v345_v27, 8.507059e+37 }
  0xc5   :  { %v319_v51 = vmul.f32 %v1423_v30, %v318_v43 }
  0xc6   :  { %v301_v56 = vadd.f32 %v1421_v29, %v300_v49 }
  0xc7   :  { %v1425_v55 = vpop.eup %1424  ;;  %v320_v62 = vadd.f32 %v1423_v30, %v319_v51 }
  0xc8   :  { %v1427_v59 = vpop.eup %1426  ;;  %v337_v60 = vmul.f32 %v1425_v55, %v335_v26  ;;  %v305_v0 = vsel %vm304_vm4, %v1421_v29, %v301_v56  ;;  %vm342_vm8 = vweird.f32 %v1425_v55  ;;  %v358_v26 = vld [vmem:[#allocation2 + $0x20] sm:$0xff]  ;;  %v361_v56 = vld [vmem:[#allocation2 + $0x38] sm:$0xff] }
  0xc9   :  { %v310_v5 = vsel %vm307_vm5, %v309_v61, %v305_v0  ;;  %v324_v10 = vsel %vm323_vm6, %v1423_v30, %v320_v62  ;;  %vm343_vm10 = vmor %vm341_vm9, %vm342_vm8 }
  0xca   :  { %v338_v4 = vsub.f32 1.0, %v337_v60  ;;  %v329_v11 = vsel %vm326_vm7, %v328_v63, %v324_v10  ;;  %v352_v15 = vmul.f32 %v1427_v59, %v310_v5 }
  0xcb   :  { %v351_v18 = vmul.f32 0.0, %v329_v11 }
  0xcc   :  { %v339_v22 = vmul.f32 %v1425_v55, %v338_v4 }
  0xcd   :  { %v1809_v23 = vadd.f32 %v352_v15, %v351_v18 }
  0xce   :  { %v340_v13 = vadd.f32 %v1425_v55, %v339_v22  ;;  %v360_v22 = vld [vmem:[#allocation2 + $0x30] sm:$0xff] }
  0xcf   :  { %1428 = vtanh.f32 %v1809_v23 }
  0xd0   :  { %v344_v29 = vsel %vm343_vm10, %v1425_v55, %v340_v13 }
  0xd1   :  { %v349_v30 = vsel %vm346_vm11, %v348_v31, %v344_v29 }
  0xd5   :  { %v1429_v35 = vpop.eup %1428 }
  0xd6   :  { %v355_v40 = vmul.f32 %v1429_v35, %v349_v30 }
  0xd8   :  { %v356_v43 = vpack.c.bf16 %v355_v40, %v355_v40 }
  0xda   :  { %370 = vmatmul.bf16.vlgmr.msrb.gmra.mxu0 %v356_v43  ;;  %383 = vmatmul.bf16.vlgmr.msrb.gmra.mxu1 %v356_v43 }
  0xdb   :  { %396 = vmatmul.bf16.vlgmr.msrb.gmra.mxu2 %v356_v43  ;;  %409 = vmatmul.bf16.vlgmr.msrb.gmra.mxu3 %v356_v43 }
  0xdc   :  { %604 = vmatpush.bf16.msrb.mxu0 %v1649_v3  ;;  %617 = vmatpush.bf16.msrb.mxu1 %v1651_v7 }
  0xdd   :  { %630 = vmatpush.bf16.msrb.mxu2 %v1664_v21  ;;  %643 = vmatpush.bf16.msrb.mxu3 %v1653_v8 }
  0xe0   :  { %605 = vmatpush.bf16.msrb.mxu0 %v1656_v12  ;;  %618 = vmatpush.bf16.msrb.mxu1 %v1660_v16 }
  0xe1   :  { %631 = vmatpush.bf16.msrb.mxu2 %v1676_v34  ;;  %644 = vmatpush.bf16.msrb.mxu3 %v1662_v17 }
  0xe4   :  { %606 = vmatpush.bf16.msrb.mxu0 %v1668_v28  ;;  %619 = vmatpush.bf16.msrb.mxu1 %v1672_v32 }
  0xe5   :  { %632 = vmatpush.bf16.msrb.mxu2 %v1682_v42  ;;  %645 = vmatpush.bf16.msrb.mxu3 %v1674_v33 }
  0xe8   :  { %607 = vmatpush.bf16.msrb.mxu0 %v1680_v41  ;;  %620 = vmatpush.bf16.msrb.mxu1 %v1686_v45 }
  0xe9   :  { %633 = vmatpush.bf16.msrb.mxu2 %v1694_v54  ;;  %646 = vmatpush.bf16.msrb.mxu3 %v1688_v46 }
  0xec   :  { %608 = vmatpush.bf16.msrb.mxu0 %v1692_v53  ;;  %621 = vmatpush.bf16.msrb.mxu1 %v1698_v57 }
  0xed   :  { %634 = vmatpush.bf16.msrb.mxu2 %v1706_v2  ;;  %647 = vmatpush.bf16.msrb.mxu3 %v1700_v58 }
  0xf0   :  { %609 = vmatpush.bf16.msrb.mxu0 %v1704_v1  ;;  %622 = vmatpush.bf16.msrb.mxu1 %v1710_v6 }
  0xf1   :  { %635 = vmatpush.bf16.msrb.mxu2 %v1718_v20  ;;  %648 = vmatpush.bf16.msrb.mxu3 %v1712_v9 }
  0xf4   :  { %610 = vmatpush.bf16.msrb.mxu0 %v1716_v19  ;;  %623 = vmatpush.bf16.msrb.mxu1 %v1722_v24 }
  0xf5   :  { %636 = vmatpush.bf16.msrb.mxu2 %v1730_v37  ;;  %649 = vmatpush.bf16.msrb.mxu3 %v1724_v25 }
  0xf8   :  { %611 = vmatpush.bf16.msrb.mxu0 %v1728_v36  ;;  %624 = vmatpush.bf16.msrb.mxu1 %v1734_v38 }
  0xf9   :  { %637 = vmatpush.bf16.msrb.mxu2 %v1742_v44  ;;  %650 = vmatpush.bf16.msrb.mxu3 %v1736_v39 }
 0x157   :  { %v371_v48 = vpop.f32.mrf.mxu0  ;;  %v384_v49 = vpop.f32.mrf.mxu1 }
 0x158   :  { %v372_v50 = vadd.f32 %v371_v48, %v358_v26  ;;  %v385_v51 = vadd.f32 %v384_v49, %v359_v47 }
 0x15a   :  { %v1353_v52 = vmul.f32 -1.442695, %v372_v50  ;;  %v1354_v55 = vmul.f32 -1.442695, %v385_v51 }
 0x15c   :  { %1430 = vpow2.f32 %v1353_v52 }
 0x15d   :  { %1432 = vpow2.f32 %v1354_v55 }
 0x15e   :  { %v397_v59 = vpop.f32.mrf.mxu2  ;;  %v410_v60 = vpop.f32.mrf.mxu3 }
 0x15f   :  { %v411_v61 = vadd.f32 %v410_v60, %v361_v56  ;;  %v373_v62 = vpop.f32.mrf.mxu0  ;;  %v386_v63 = vpop.f32.mrf.mxu1  ;;  %v398_v29 = vadd.f32 %v397_v59, %v360_v22 }
 0x161   :  { %v1355_v0 = vmul.f32 -1.442695, %v411_v61 }
 0x162   :  { %v1431_v4 = vpop.eup %1430 }
 0x163   :  { %v1433_v5 = vpop.eup %1432  ;;  %v417_v10 = vadd.f32 1.0, %v1431_v4  ;;  %1434 = vpow2.f32 %v1355_v0 }
 0x164   :  { %v436_v11 = vadd.f32 1.0, %v1433_v5 }
 0x165   :  { %1436 = vrcp.f32 %v417_v10  ;;  %v429_v26 = vand.u32 2147483648, %v417_v10  ;;  %v427_v49 = vand.u32 2147483647, %v417_v10  ;;  %vm423_vm14 = vweird.f32 %v417_v10 }
 0x166   :  { %1438 = vrcp.f32 %v436_v11  ;;  %v399_v15 = vpop.f32.mrf.mxu2  ;;  %v412_v18 = vpop.f32.mrf.mxu3  ;;  %v448_v47 = vand.u32 2147483648, %v436_v11  ;;  %v446_v51 = vand.u32 2147483647, %v436_v11  ;;  %vm442_vm15 = vweird.f32 %v436_v11 }
 0x167   :  { %v430_v56 = vor.u32 1.1754944e-38, %v429_v26  ;;  %vm428_vm2 = vcmp.eq.f32.partialorder %v427_v49, 8.507059e+37 }
 0x168   :  { %v449_v61 = vor.u32 1.1754944e-38, %v448_v47  ;;  %vm447_vm3 = vcmp.eq.f32.partialorder %v446_v51, 8.507059e+37 }
 0x169   :  { %v1435_v13 = vpop.eup %1434 }
 0x16a   :  { %v456_v14 = vadd.f32 1.0, %v1435_v13 }
 0x16b   :  { %v1437_v27 = vpop.eup %1436 }
 0x16c   :  { %v1439_v31 = vpop.eup %1438  ;;  %v419_v35 = vmul.f32 %v1437_v27, %v417_v10  ;;  %1440 = vrcp.f32 %v456_v14  ;;  %vm424_vm12 = vweird.f32 %v1437_v27  ;;  %vm462_vm5 = vweird.f32 %v456_v14 }
 0x16d   :  { %v438_v30 = vmul.f32 %v1439_v31, %v436_v11  ;;  %1442 = vtanh.f32 %v398_v29  ;;  %vm443_vm13 = vweird.f32 %v1439_v31  ;;  %vm425_vm0 = vmor %vm423_vm14, %vm424_vm12  ;;  %v468_v29 = vand.u32 2147483648, %v456_v14 }
 0x16e   :  { %v420_v40 = vsub.f32 1.0, %v419_v35  ;;  %vm444_vm1 = vmor %vm442_vm15, %vm443_vm13 }
 0x16f   :  { %v439_v43 = vsub.f32 1.0, %v438_v30  ;;  %v469_v30 = vor.u32 1.1754944e-38, %v468_v29 }
 0x170   :  { %v421_v48 = vmul.f32 %v1437_v27, %v420_v40 }
 0x171   :  { %v440_v50 = vmul.f32 %v1439_v31, %v439_v43 }
 0x172   :  { %v1441_v52 = vpop.eup %1440  ;;  %v422_v55 = vadd.f32 %v1437_v27, %v421_v48 }
 0x173   :  { %v441_v59 = vadd.f32 %v1439_v31, %v440_v50  ;;  %v458_v60 = vmul.f32 %v1441_v52, %v456_v14  ;;  %v1443_v63 = vpop.eup %1442  ;;  %vm463_vm4 = vweird.f32 %v1441_v52 }
 0x174   :  { %v426_v62 = vsel %vm425_vm0, %v1437_v27, %v422_v55  ;;  %v466_v27 = vand.u32 2147483647, %v456_v14  ;;  %vm464_vm6 = vmor %vm462_vm5, %vm463_vm4  ;;  %v480_v14 = vld [vmem:[#allocation2 + $0x48] sm:$0xff]  ;;  %v482_v55 = vld [vmem:[#allocation2 + $0x58] sm:$0xff] }
 0x175   :  { %v431_v0 = vsel %vm428_vm2, %v430_v56, %v426_v62  ;;  %v445_v4 = vsel %vm444_vm1, %v1439_v31, %v441_v59  ;;  %v459_v5 = vsub.f32 1.0, %v458_v60 }
 0x176   :  { %v450_v15 = vsel %vm447_vm3, %v449_v61, %v445_v4  ;;  %v473_v18 = vmul.f32 %v1443_v63, %v431_v0  ;;  %vm467_vm7 = vcmp.eq.f32.partialorder %v466_v27, 8.507059e+37 }
 0x177   :  { %v472_v22 = vmul.f32 %v450_v15, %v1809_v23  ;;  %v460_v13 = vmul.f32 %v1441_v52, %v459_v5  ;;  %v479_v23 = vld [vmem:[#allocation2 + $0x40] sm:$0xff] }
 0x179   :  { %v1845_v10 = vadd.f32 %v473_v18, %v472_v22  ;;  %v461_v11 = vadd.f32 %v1441_v52, %v460_v13  ;;  %v481_v13 = vld [vmem:[#allocation2 + $0x50] sm:$0xff] }
 0x17b   :  { %1444 = vtanh.f32 %v1845_v10  ;;  %v465_v35 = vsel %vm464_vm6, %v1441_v52, %v461_v11 }
 0x17c   :  { %v470_v40 = vsel %vm467_vm7, %v469_v30, %v465_v35 }
 0x181   :  { %v1445_v31 = vpop.eup %1444 }
 0x182   :  { %v476_v43 = vmul.f32 %v1445_v31, %v470_v40 }
 0x184   :  { %v477_v26 = vpack.c.bf16 %v476_v43, %v476_v43 }
 0x186   :  { %491 = vmatmul.bf16.vlgmr.msra.gmra.mxu0 %v477_v26  ;;  %504 = vmatmul.bf16.vlgmr.msra.gmra.mxu1 %v477_v26 }
 0x187   :  { %517 = vmatmul.bf16.vlgmr.msra.gmra.mxu2 %v477_v26  ;;  %530 = vmatmul.bf16.vlgmr.msra.gmra.mxu3 %v477_v26 }
 0x188   :  { %725 = vmatpush.bf16.msra.mxu0 %v1649_v3  ;;  %738 = vmatpush.bf16.msra.mxu1 %v1651_v7 }
 0x189   :  { %751 = vmatpush.bf16.msra.mxu2 %v1664_v21  ;;  %764 = vmatpush.bf16.msra.mxu3 %v1653_v8 }
 0x18c   :  { %726 = vmatpush.bf16.msra.mxu0 %v1656_v12  ;;  %739 = vmatpush.bf16.msra.mxu1 %v1660_v16 }
 0x18d   :  { %752 = vmatpush.bf16.msra.mxu2 %v1676_v34  ;;  %765 = vmatpush.bf16.msra.mxu3 %v1662_v17 }
 0x190   :  { %727 = vmatpush.bf16.msra.mxu0 %v1668_v28  ;;  %740 = vmatpush.bf16.msra.mxu1 %v1672_v32 }
 0x191   :  { %753 = vmatpush.bf16.msra.mxu2 %v1682_v42  ;;  %766 = vmatpush.bf16.msra.mxu3 %v1674_v33 }
 0x194   :  { %728 = vmatpush.bf16.msra.mxu0 %v1680_v41  ;;  %741 = vmatpush.bf16.msra.mxu1 %v1686_v45 }
 0x195   :  { %754 = vmatpush.bf16.msra.mxu2 %v1694_v54  ;;  %767 = vmatpush.bf16.msra.mxu3 %v1688_v46 }
 0x198   :  { %729 = vmatpush.bf16.msra.mxu0 %v1692_v53  ;;  %742 = vmatpush.bf16.msra.mxu1 %v1698_v57 }
 0x199   :  { %755 = vmatpush.bf16.msra.mxu2 %v1706_v2  ;;  %768 = vmatpush.bf16.msra.mxu3 %v1700_v58 }
 0x19c   :  { %730 = vmatpush.bf16.msra.mxu0 %v1704_v1  ;;  %743 = vmatpush.bf16.msra.mxu1 %v1710_v6 }
 0x19d   :  { %756 = vmatpush.bf16.msra.mxu2 %v1718_v20  ;;  %769 = vmatpush.bf16.msra.mxu3 %v1712_v9 }
 0x1a0   :  { %731 = vmatpush.bf16.msra.mxu0 %v1716_v19  ;;  %744 = vmatpush.bf16.msra.mxu1 %v1722_v24 }
 0x1a1   :  { %757 = vmatpush.bf16.msra.mxu2 %v1730_v37  ;;  %770 = vmatpush.bf16.msra.mxu3 %v1724_v25 }
 0x1a4   :  { %732 = vmatpush.bf16.msra.mxu0 %v1728_v36  ;;  %745 = vmatpush.bf16.msra.mxu1 %v1734_v38 }
 0x1a5   :  { %758 = vmatpush.bf16.msra.mxu2 %v1742_v44  ;;  %771 = vmatpush.bf16.msra.mxu3 %v1736_v39 }
 0x203   :  { %v492_v47 = vpop.f32.mrf.mxu0  ;;  %v505_v48 = vpop.f32.mrf.mxu1 }
 0x204   :  { %v493_v49 = vadd.f32 %v492_v47, %v479_v23  ;;  %v506_v50 = vadd.f32 %v505_v48, %v480_v14 }
 0x206   :  { %v1356_v51 = vmul.f32 -1.442695, %v493_v49  ;;  %v1357_v52 = vmul.f32 -1.442695, %v506_v50 }
 0x208   :  { %1446 = vpow2.f32 %v1356_v51 }
 0x209   :  { %1448 = vpow2.f32 %v1357_v52 }
 0x20a   :  { %v518_v56 = vpop.f32.mrf.mxu2  ;;  %v531_v59 = vpop.f32.mrf.mxu3 }
 0x20b   :  { %v532_v60 = vadd.f32 %v531_v59, %v482_v55  ;;  %v494_v61 = vpop.f32.mrf.mxu0  ;;  %v507_v62 = vpop.f32.mrf.mxu1  ;;  %v519_v35 = vadd.f32 %v518_v56, %v481_v13 }
 0x20d   :  { %v1358_v63 = vmul.f32 -1.442695, %v532_v60 }
 0x20e   :  { %v1447_v0 = vpop.eup %1446 }
 0x20f   :  { %v1449_v4 = vpop.eup %1448  ;;  %v538_v5 = vadd.f32 1.0, %v1447_v0  ;;  %1450 = vpow2.f32 %v1358_v63 }
 0x210   :  { %v557_v15 = vadd.f32 1.0, %v1449_v4 }
 0x211   :  { %1452 = vrcp.f32 %v538_v5  ;;  %v550_v23 = vand.u32 2147483648, %v538_v5  ;;  %v548_v48 = vand.u32 2147483647, %v538_v5  ;;  %vm544_vm10 = vweird.f32 %v538_v5 }
 0x212   :  { %1454 = vrcp.f32 %v557_v15  ;;  %v520_v18 = vpop.f32.mrf.mxu2  ;;  %v533_v22 = vpop.f32.mrf.mxu3  ;;  %v569_v14 = vand.u32 2147483648, %v557_v15  ;;  %v567_v50 = vand.u32 2147483647, %v557_v15  ;;  %vm563_vm11 = vweird.f32 %v557_v15 }
 0x213   :  { %v551_v55 = vor.u32 1.1754944e-38, %v550_v23  ;;  %vm549_vm14 = vcmp.eq.f32.partialorder %v548_v48, 8.507059e+37 }
 0x214   :  { %v570_v60 = vor.u32 1.1754944e-38, %v569_v14  ;;  %vm568_vm15 = vcmp.eq.f32.partialorder %v567_v50, 8.507059e+37 }
 0x215   :  { %v1451_v11 = vpop.eup %1450 }
 0x216   :  { %v577_v29 = vadd.f32 1.0, %v1451_v11 }
 0x217   :  { %v1453_v27 = vpop.eup %1452 }
 0x218   :  { %v1455_v30 = vpop.eup %1454  ;;  %v540_v31 = vmul.f32 %v1453_v27, %v538_v5  ;;  %1456 = vrcp.f32 %v577_v29  ;;  %vm545_vm8 = vweird.f32 %v1453_v27  ;;  %vm583_vm1 = vweird.f32 %v577_v29 }
 0x219   :  { %v559_v40 = vmul.f32 %v1455_v30, %v557_v15  ;;  %1458 = vtanh.f32 %v519_v35  ;;  %vm564_vm9 = vweird.f32 %v1455_v30  ;;  %vm546_vm12 = vmor %vm544_vm10, %vm545_vm8  ;;  %v589_v35 = vand.u32 2147483648, %v577_v29 }
 0x21a   :  { %v541_v43 = vsub.f32 1.0, %v540_v31  ;;  %vm565_vm13 = vmor %vm563_vm11, %vm564_vm9 }
 0x21b   :  { %v560_v26 = vsub.f32 1.0, %v559_v40  ;;  %v590_v40 = vor.u32 1.1754944e-38, %v589_v35 }
 0x21c   :  { %v542_v47 = vmul.f32 %v1453_v27, %v541_v43 }
 0x21d   :  { %v561_v49 = vmul.f32 %v1455_v30, %v560_v26 }
 0x21e   :  { %v1457_v51 = vpop.eup %1456  ;;  %v543_v52 = vadd.f32 %v1453_v27, %v542_v47 }
 0x21f   :  { %v562_v56 = vadd.f32 %v1455_v30, %v561_v49  ;;  %v579_v59 = vmul.f32 %v1457_v51, %v577_v29  ;;  %v1459_v62 = vpop.eup %1458  ;;  %vm584_vm0 = vweird.f32 %v1457_v51 }
 0x220   :  { %v547_v61 = vsel %vm546_vm12, %v1453_v27, %v543_v52  ;;  %v587_v27 = vand.u32 2147483647, %v577_v29  ;;  %vm585_vm2 = vmor %vm583_vm1, %vm584_vm0  ;;  %v601_v29 = vld [vmem:[#allocation2 + $0x68] sm:$0xff]  ;;  %v603_v52 = vld [vmem:[#allocation2 + $0x78] sm:$0xff] }
 0x221   :  { %v552_v63 = vsel %vm549_vm14, %v551_v55, %v547_v61  ;;  %v566_v0 = vsel %vm565_vm13, %v1455_v30, %v562_v56  ;;  %v580_v4 = vsub.f32 1.0, %v579_v59 }
 0x222   :  { %v571_v18 = vsel %vm568_vm15, %v570_v60, %v566_v0  ;;  %v594_v22 = vmul.f32 %v1459_v62, %v552_v63  ;;  %vm588_vm3 = vcmp.eq.f32.partialorder %v587_v27, 8.507059e+37 }
 0x223   :  { %v593_v13 = vmul.f32 %v571_v18, %v1845_v10  ;;  %v581_v11 = vmul.f32 %v1457_v51, %v580_v4  ;;  %v600_v10 = vld [vmem:[#allocation2 + $0x60] sm:$0xff] }
 0x225   :  { %v1881_v5 = vadd.f32 %v594_v22, %v593_v13  ;;  %v582_v15 = vadd.f32 %v1457_v51, %v581_v11  ;;  %v602_v11 = vld [vmem:[#allocation2 + $0x70] sm:$0xff] }
 0x227   :  { %1460 = vtanh.f32 %v1881_v5  ;;  %v586_v31 = vsel %vm585_vm2, %v1457_v51, %v582_v15 }
 0x228   :  { %v591_v43 = vsel %vm588_vm3, %v590_v40, %v586_v31 }
 0x22d   :  { %v1461_v30 = vpop.eup %1460 }
 0x22e   :  { %v597_v26 = vmul.f32 %v1461_v30, %v591_v43 }
 0x230   :  { %v598_v23 = vpack.c.bf16 %v597_v26, %v597_v26 }
 0x232   :  { %612 = vmatmul.bf16.vlgmr.msrb.gmra.mxu0 %v598_v23  ;;  %625 = vmatmul.bf16.vlgmr.msrb.gmra.mxu1 %v598_v23 }
 0x233   :  { %638 = vmatmul.bf16.vlgmr.msrb.gmra.mxu2 %v598_v23  ;;  %651 = vmatmul.bf16.vlgmr.msrb.gmra.mxu3 %v598_v23 }
 0x234   :  { %846 = vmatpush.bf16.msrb.mxu0 %v1649_v3  ;;  %859 = vmatpush.bf16.msrb.mxu1 %v1651_v7 }
 0x235   :  { %872 = vmatpush.bf16.msrb.mxu2 %v1664_v21  ;;  %885 = vmatpush.bf16.msrb.mxu3 %v1653_v8 }
 0x238   :  { %847 = vmatpush.bf16.msrb.mxu0 %v1656_v12  ;;  %860 = vmatpush.bf16.msrb.mxu1 %v1660_v16 }
 0x239   :  { %873 = vmatpush.bf16.msrb.mxu2 %v1676_v34  ;;  %886 = vmatpush.bf16.msrb.mxu3 %v1662_v17 }
 0x23c   :  { %848 = vmatpush.bf16.msrb.mxu0 %v1668_v28  ;;  %861 = vmatpush.bf16.msrb.mxu1 %v1672_v32 }
 0x23d   :  { %874 = vmatpush.bf16.msrb.mxu2 %v1682_v42  ;;  %887 = vmatpush.bf16.msrb.mxu3 %v1674_v33 }
 0x240   :  { %849 = vmatpush.bf16.msrb.mxu0 %v1680_v41  ;;  %862 = vmatpush.bf16.msrb.mxu1 %v1686_v45 }
 0x241   :  { %875 = vmatpush.bf16.msrb.mxu2 %v1694_v54  ;;  %888 = vmatpush.bf16.msrb.mxu3 %v1688_v46 }
 0x244   :  { %850 = vmatpush.bf16.msrb.mxu0 %v1692_v53  ;;  %863 = vmatpush.bf16.msrb.mxu1 %v1698_v57 }
 0x245   :  { %876 = vmatpush.bf16.msrb.mxu2 %v1706_v2  ;;  %889 = vmatpush.bf16.msrb.mxu3 %v1700_v58 }
 0x248   :  { %851 = vmatpush.bf16.msrb.mxu0 %v1704_v1  ;;  %864 = vmatpush.bf16.msrb.mxu1 %v1710_v6 }
 0x249   :  { %877 = vmatpush.bf16.msrb.mxu2 %v1718_v20  ;;  %890 = vmatpush.bf16.msrb.mxu3 %v1712_v9 }
 0x24c   :  { %852 = vmatpush.bf16.msrb.mxu0 %v1716_v19  ;;  %865 = vmatpush.bf16.msrb.mxu1 %v1722_v24 }
 0x24d   :  { %878 = vmatpush.bf16.msrb.mxu2 %v1730_v37  ;;  %891 = vmatpush.bf16.msrb.mxu3 %v1724_v25 }
 0x250   :  { %853 = vmatpush.bf16.msrb.mxu0 %v1728_v36  ;;  %866 = vmatpush.bf16.msrb.mxu1 %v1734_v38 }
 0x251   :  { %879 = vmatpush.bf16.msrb.mxu2 %v1742_v44  ;;  %892 = vmatpush.bf16.msrb.mxu3 %v1736_v39 }
 0x2af   :  { %v613_v14 = vpop.f32.mrf.mxu0  ;;  %v626_v47 = vpop.f32.mrf.mxu1 }
 0x2b0   :  { %v614_v48 = vadd.f32 %v613_v14, %v600_v10  ;;  %v627_v49 = vadd.f32 %v626_v47, %v601_v29 }
 0x2b2   :  { %v1359_v50 = vmul.f32 -1.442695, %v614_v48  ;;  %v1360_v51 = vmul.f32 -1.442695, %v627_v49 }
 0x2b4   :  { %1462 = vpow2.f32 %v1359_v50 }
 0x2b5   :  { %1464 = vpow2.f32 %v1360_v51 }
 0x2b6   :  { %v639_v55 = vpop.f32.mrf.mxu2  ;;  %v652_v56 = vpop.f32.mrf.mxu3 }
 0x2b7   :  { %v653_v59 = vadd.f32 %v652_v56, %v603_v52  ;;  %v615_v60 = vpop.f32.mrf.mxu0  ;;  %v628_v61 = vpop.f32.mrf.mxu1  ;;  %v640_v31 = vadd.f32 %v639_v55, %v602_v11 }
 0x2b9   :  { %v1361_v62 = vmul.f32 -1.442695, %v653_v59 }
 0x2ba   :  { %v1463_v63 = vpop.eup %1462 }
 0x2bb   :  { %v1465_v0 = vpop.eup %1464  ;;  %v659_v4 = vadd.f32 1.0, %v1463_v63  ;;  %1466 = vpow2.f32 %v1361_v62 }
 0x2bc   :  { %v678_v18 = vadd.f32 1.0, %v1465_v0 }
 0x2bd   :  { %1468 = vrcp.f32 %v659_v4  ;;  %v671_v10 = vand.u32 2147483648, %v659_v4  ;;  %v669_v47 = vand.u32 2147483647, %v659_v4  ;;  %vm665_vm6 = vweird.f32 %v659_v4 }
 0x2be   :  { %1470 = vrcp.f32 %v678_v18  ;;  %v641_v22 = vpop.f32.mrf.mxu2  ;;  %v654_v13 = vpop.f32.mrf.mxu3  ;;  %v690_v29 = vand.u32 2147483648, %v678_v18  ;;  %v688_v49 = vand.u32 2147483647, %v678_v18  ;;  %vm684_vm7 = vweird.f32 %v678_v18 }
 0x2bf   :  { %v672_v52 = vor.u32 1.1754944e-38, %v671_v10  ;;  %vm670_vm10 = vcmp.eq.f32.partialorder %v669_v47, 8.507059e+37 }
 0x2c0   :  { %v691_v59 = vor.u32 1.1754944e-38, %v690_v29  ;;  %vm689_vm11 = vcmp.eq.f32.partialorder %v688_v49, 8.507059e+37 }
 0x2c1   :  { %v1467_v15 = vpop.eup %1466 }
 0x2c2   :  { %v698_v35 = vadd.f32 1.0, %v1467_v15 }
 0x2c3   :  { %v1469_v27 = vpop.eup %1468 }
 0x2c4   :  { %v1471_v40 = vpop.eup %1470  ;;  %v661_v30 = vmul.f32 %v1469_v27, %v659_v4  ;;  %1472 = vrcp.f32 %v698_v35  ;;  %vm666_vm4 = vweird.f32 %v1469_v27  ;;  %vm704_vm13 = vweird.f32 %v698_v35 }
 0x2c5   :  { %v680_v43 = vmul.f32 %v1471_v40, %v678_v18  ;;  %1474 = vtanh.f32 %v640_v31  ;;  %vm685_vm5 = vweird.f32 %v1471_v40  ;;  %vm667_vm8 = vmor %vm665_vm6, %vm666_vm4  ;;  %v710_v31 = vand.u32 2147483648, %v698_v35 }
 0x2c6   :  { %v662_v26 = vsub.f32 1.0, %v661_v30  ;;  %vm686_vm9 = vmor %vm684_vm7, %vm685_vm5 }
 0x2c7   :  { %v681_v23 = vsub.f32 1.0, %v680_v43  ;;  %v711_v43 = vor.u32 1.1754944e-38, %v710_v31 }
 0x2c8   :  { %v663_v14 = vmul.f32 %v1469_v27, %v662_v26 }
 0x2c9   :  { %v682_v48 = vmul.f32 %v1471_v40, %v681_v23 }
 0x2ca   :  { %v1473_v50 = vpop.eup %1472  ;;  %v664_v51 = vadd.f32 %v1469_v27, %v663_v14 }
 0x2cb   :  { %v683_v55 = vadd.f32 %v1471_v40, %v682_v48  ;;  %v700_v56 = vmul.f32 %v1473_v50, %v698_v35  ;;  %v1475_v61 = vpop.eup %1474  ;;  %vm705_vm12 = vweird.f32 %v1473_v50 }
 0x2cc   :  { %v668_v60 = vsel %vm667_vm8, %v1469_v27, %v664_v51  ;;  %v708_v27 = vand.u32 2147483647, %v698_v35  ;;  %vm706_vm14 = vmor %vm704_vm13, %vm705_vm12  ;;  %v722_v35 = vld [vmem:[#allocation2 + $0x88] sm:$0xff]  ;;  %v724_v51 = vld [vmem:[#allocation2 + $0x98] sm:$0xff] }
 0x2cd   :  { %v673_v62 = vsel %vm670_vm10, %v672_v52, %v668_v60  ;;  %v687_v63 = vsel %vm686_vm9, %v1471_v40, %v683_v55  ;;  %v701_v0 = vsub.f32 1.0, %v700_v56 }
 0x2ce   :  { %v692_v22 = vsel %vm689_vm11, %v691_v59, %v687_v63  ;;  %v715_v13 = vmul.f32 %v1475_v61, %v673_v62  ;;  %vm709_vm15 = vcmp.eq.f32.partialorder %v708_v27, 8.507059e+37 }
 0x2cf   :  { %v714_v11 = vmul.f32 %v692_v22, %v1881_v5  ;;  %v702_v15 = vmul.f32 %v1473_v50, %v701_v0  ;;  %v721_v5 = vld [vmem:[#allocation2 + $0x80] sm:$0xff] }
 0x2d1   :  { %v1917_v4 = vadd.f32 %v715_v13, %v714_v11  ;;  %v703_v18 = vadd.f32 %v1473_v50, %v702_v15  ;;  %v723_v15 = vld [vmem:[#allocation2 + $0x90] sm:$0xff] }
 0x2d3   :  { %1476 = vtanh.f32 %v1917_v4  ;;  %v707_v30 = vsel %vm706_vm14, %v1473_v50, %v703_v18 }
 0x2d4   :  { %v712_v26 = vsel %vm709_vm15, %v711_v43, %v707_v30 }
 0x2d9   :  { %v1477_v40 = vpop.eup %1476 }
 0x2da   :  { %v718_v23 = vmul.f32 %v1477_v40, %v712_v26 }
 0x2dc   :  { %v719_v10 = vpack.c.bf16 %v718_v23, %v718_v23 }
 0x2de   :  { %733 = vmatmul.bf16.vlgmr.msra.gmra.mxu0 %v719_v10  ;;  %746 = vmatmul.bf16.vlgmr.msra.gmra.mxu1 %v719_v10 }
 0x2df   :  { %759 = vmatmul.bf16.vlgmr.msra.gmra.mxu2 %v719_v10  ;;  %772 = vmatmul.bf16.vlgmr.msra.gmra.mxu3 %v719_v10 }
 0x2e0   :  { %967 = vmatpush.bf16.msra.mxu0 %v1649_v3  ;;  %980 = vmatpush.bf16.msra.mxu1 %v1651_v7 }
 0x2e1   :  { %993 = vmatpush.bf16.msra.mxu2 %v1664_v21  ;;  %1006 = vmatpush.bf16.msra.mxu3 %v1653_v8 }
 0x2e4   :  { %968 = vmatpush.bf16.msra.mxu0 %v1656_v12  ;;  %981 = vmatpush.bf16.msra.mxu1 %v1660_v16 }
 0x2e5   :  { %994 = vmatpush.bf16.msra.mxu2 %v1676_v34  ;;  %1007 = vmatpush.bf16.msra.mxu3 %v1662_v17 }
 0x2e8   :  { %969 = vmatpush.bf16.msra.mxu0 %v1668_v28  ;;  %982 = vmatpush.bf16.msra.mxu1 %v1672_v32 }
 0x2e9   :  { %995 = vmatpush.bf16.msra.mxu2 %v1682_v42  ;;  %1008 = vmatpush.bf16.msra.mxu3 %v1674_v33 }
 0x2ec   :  { %970 = vmatpush.bf16.msra.mxu0 %v1680_v41  ;;  %983 = vmatpush.bf16.msra.mxu1 %v1686_v45 }
 0x2ed   :  { %996 = vmatpush.bf16.msra.mxu2 %v1694_v54  ;;  %1009 = vmatpush.bf16.msra.mxu3 %v1688_v46 }
 0x2f0   :  { %971 = vmatpush.bf16.msra.mxu0 %v1692_v53  ;;  %984 = vmatpush.bf16.msra.mxu1 %v1698_v57 }
 0x2f1   :  { %997 = vmatpush.bf16.msra.mxu2 %v1706_v2  ;;  %1010 = vmatpush.bf16.msra.mxu3 %v1700_v58 }
 0x2f4   :  { %972 = vmatpush.bf16.msra.mxu0 %v1704_v1  ;;  %985 = vmatpush.bf16.msra.mxu1 %v1710_v6 }
 0x2f5   :  { %998 = vmatpush.bf16.msra.mxu2 %v1718_v20  ;;  %1011 = vmatpush.bf16.msra.mxu3 %v1712_v9 }
 0x2f8   :  { %973 = vmatpush.bf16.msra.mxu0 %v1716_v19  ;;  %986 = vmatpush.bf16.msra.mxu1 %v1722_v24 }
 0x2f9   :  { %999 = vmatpush.bf16.msra.mxu2 %v1730_v37  ;;  %1012 = vmatpush.bf16.msra.mxu3 %v1724_v25 }
 0x2fc   :  { %974 = vmatpush.bf16.msra.mxu0 %v1728_v36  ;;  %987 = vmatpush.bf16.msra.mxu1 %v1734_v38 }
 0x2fd   :  { %1000 = vmatpush.bf16.msra.mxu2 %v1742_v44  ;;  %1013 = vmatpush.bf16.msra.mxu3 %v1736_v39 }
 0x35b   :  { %v734_v29 = vpop.f32.mrf.mxu0  ;;  %v747_v14 = vpop.f32.mrf.mxu1 }
 0x35c   :  { %v735_v47 = vadd.f32 %v734_v29, %v721_v5  ;;  %v748_v48 = vadd.f32 %v747_v14, %v722_v35 }
 0x35e   :  { %v1362_v49 = vmul.f32 -1.442695, %v735_v47  ;;  %v1363_v50 = vmul.f32 -1.442695, %v748_v48 }
 0x360   :  { %1478 = vpow2.f32 %v1362_v49 }
 0x361   :  { %1480 = vpow2.f32 %v1363_v50 }
 0x362   :  { %v760_v52 = vpop.f32.mrf.mxu2  ;;  %v773_v55 = vpop.f32.mrf.mxu3 }
 0x363   :  { %v774_v56 = vadd.f32 %v773_v55, %v724_v51  ;;  %v736_v59 = vpop.f32.mrf.mxu0  ;;  %v749_v60 = vpop.f32.mrf.mxu1  ;;  %v761_v30 = vadd.f32 %v760_v52, %v723_v15 }
 0x365   :  { %v1364_v61 = vmul.f32 -1.442695, %v774_v56 }
 0x366   :  { %v1479_v62 = vpop.eup %1478 }
 0x367   :  { %v1481_v63 = vpop.eup %1480  ;;  %v780_v0 = vadd.f32 1.0, %v1479_v62  ;;  %1482 = vpow2.f32 %v1364_v61 }
 0x368   :  { %v799_v22 = vadd.f32 1.0, %v1481_v63 }
 0x369   :  { %1484 = vrcp.f32 %v780_v0  ;;  %v792_v5 = vand.u32 2147483648, %v780_v0  ;;  %v790_v14 = vand.u32 2147483647, %v780_v0  ;;  %vm786_vm2 = vweird.f32 %v780_v0 }
 0x36a   :  { %1486 = vrcp.f32 %v799_v22  ;;  %v762_v13 = vpop.f32.mrf.mxu2  ;;  %v775_v11 = vpop.f32.mrf.mxu3  ;;  %v811_v35 = vand.u32 2147483648, %v799_v22  ;;  %v809_v48 = vand.u32 2147483647, %v799_v22  ;;  %vm805_vm3 = vweird.f32 %v799_v22 }
 0x36b   :  { %v793_v51 = vor.u32 1.1754944e-38, %v792_v5  ;;  %vm791_vm6 = vcmp.eq.f32.partialorder %v790_v14, 8.507059e+37 }
 0x36c   :  { %v812_v56 = vor.u32 1.1754944e-38, %v811_v35  ;;  %vm810_vm7 = vcmp.eq.f32.partialorder %v809_v48, 8.507059e+37 }
 0x36d   :  { %v1483_v18 = vpop.eup %1482 }
 0x36e   :  { %v819_v31 = vadd.f32 1.0, %v1483_v18 }
 0x36f   :  { %v1485_v27 = vpop.eup %1484 }
 0x370   :  { %v1487_v43 = vpop.eup %1486  ;;  %v782_v40 = vmul.f32 %v1485_v27, %v780_v0  ;;  %1488 = vrcp.f32 %v819_v31  ;;  %vm787_vm0 = vweird.f32 %v1485_v27  ;;  %vm825_vm9 = vweird.f32 %v819_v31 }
 0x371   :  { %v801_v26 = vmul.f32 %v1487_v43, %v799_v22  ;;  %1490 = vtanh.f32 %v761_v30  ;;  %vm806_vm1 = vweird.f32 %v1487_v43  ;;  %vm788_vm4 = vmor %vm786_vm2, %vm787_vm0  ;;  %v831_v30 = vand.u32 2147483648, %v819_v31 }
 0x372   :  { %v783_v23 = vsub.f32 1.0, %v782_v40  ;;  %vm807_vm5 = vmor %vm805_vm3, %vm806_vm1 }
 0x373   :  { %v802_v10 = vsub.f32 1.0, %v801_v26  ;;  %v832_v26 = vor.u32 1.1754944e-38, %v831_v30 }
 0x374   :  { %v784_v29 = vmul.f32 %v1485_v27, %v783_v23 }
 0x375   :  { %v803_v47 = vmul.f32 %v1487_v43, %v802_v10 }
 0x376   :  { %v1489_v49 = vpop.eup %1488  ;;  %v785_v50 = vadd.f32 %v1485_v27, %v784_v29 }
 0x377   :  { %v804_v52 = vadd.f32 %v1487_v43, %v803_v47  ;;  %v821_v55 = vmul.f32 %v1489_v49, %v819_v31  ;;  %v1491_v60 = vpop.eup %1490  ;;  %vm826_vm8 = vweird.f32 %v1489_v49 }
 0x378   :  { %v789_v59 = vsel %vm788_vm4, %v1485_v27, %v785_v50  ;;  %v829_v27 = vand.u32 2147483647, %v819_v31  ;;  %vm827_vm10 = vmor %vm825_vm9, %vm826_vm8 }
 0x379   :  { %v794_v61 = vsel %vm791_vm6, %v793_v51, %v789_v59  ;;  %v808_v62 = vsel %vm807_vm5, %v1487_v43, %v804_v52  ;;  %v822_v63 = vsub.f32 1.0, %v821_v55 }
 0x37a   :  { %v813_v13 = vsel %vm810_vm7, %v812_v56, %v808_v62  ;;  %v836_v11 = vmul.f32 %v1491_v60, %v794_v61  ;;  %vm830_vm11 = vcmp.eq.f32.partialorder %v829_v27, 8.507059e+37 }
 0x37b   :  { %v835_v15 = vmul.f32 %v813_v13, %v1917_v4  ;;  %v823_v18 = vmul.f32 %v1489_v49, %v822_v63 }
 0x37d   :  { %v1953_v0 = vadd.f32 %v836_v11, %v835_v15  ;;  %v824_v22 = vadd.f32 %v1489_v49, %v823_v18 }
 0x37f   :  { %1492 = vtanh.f32 %v1953_v0  ;;  %v828_v40 = vsel %vm827_vm10, %v1489_v49, %v824_v22 }
 0x380   :  { %v833_v23 = vsel %vm830_vm11, %v832_v26, %v828_v40 }
 0x385   :  { %v1493_v43 = vpop.eup %1492 }
 0x386   :  { %v839_v10 = vmul.f32 %v1493_v43, %v833_v23 }
 0x388   :  { %v840_v5 = vpack.c.bf16 %v839_v10, %v839_v10 }
 0x38a   :  { %854 = vmatmul.bf16.vlgmr.msrb.gmra.mxu0 %v840_v5  ;;  %867 = vmatmul.bf16.vlgmr.msrb.gmra.mxu1 %v840_v5 }
 0x38b   :  { %880 = vmatmul.bf16.vlgmr.msrb.gmra.mxu2 %v840_v5  ;;  %893 = vmatmul.bf16.vlgmr.msrb.gmra.mxu3 %v840_v5  ;;  %v964_v5 = vld [vmem:[#allocation2 + $0xc8] sm:$0xff] }
 0x38c   :  { %1088 = vmatpush.bf16.msrb.mxu0 %v1649_v3  ;;  %1101 = vmatpush.bf16.msrb.mxu1 %v1651_v7  ;;  %v842_v3 = vld [vmem:[#allocation2 + $0xa0] sm:$0xff]  ;;  %v843_v7 = vld [vmem:[#allocation2 + $0xa8] sm:$0xff] }
 0x38d   :  { %1114 = vmatpush.bf16.msrb.mxu2 %v1664_v21  ;;  %1127 = vmatpush.bf16.msrb.mxu3 %v1653_v8 }
 0x390   :  { %1089 = vmatpush.bf16.msrb.mxu0 %v1656_v12  ;;  %1102 = vmatpush.bf16.msrb.mxu1 %v1660_v16 }
 0x391   :  { %1115 = vmatpush.bf16.msrb.mxu2 %v1676_v34  ;;  %1128 = vmatpush.bf16.msrb.mxu3 %v1662_v17 }
 0x394   :  { %1090 = vmatpush.bf16.msrb.mxu0 %v1668_v28  ;;  %1103 = vmatpush.bf16.msrb.mxu1 %v1672_v32  ;;  %v845_v32 = vld [vmem:[#allocation2 + $0xb8] sm:$0xff] }
 0x395   :  { %1116 = vmatpush.bf16.msrb.mxu2 %v1682_v42  ;;  %1129 = vmatpush.bf16.msrb.mxu3 %v1674_v33 }
 0x398   :  { %1091 = vmatpush.bf16.msrb.mxu0 %v1680_v41  ;;  %1104 = vmatpush.bf16.msrb.mxu1 %v1686_v45 }
 0x399   :  { %1117 = vmatpush.bf16.msrb.mxu2 %v1694_v54  ;;  %1130 = vmatpush.bf16.msrb.mxu3 %v1688_v46 }
 0x39c   :  { %1092 = vmatpush.bf16.msrb.mxu0 %v1692_v53  ;;  %1105 = vmatpush.bf16.msrb.mxu1 %v1698_v57 }
 0x39d   :  { %1118 = vmatpush.bf16.msrb.mxu2 %v1706_v2  ;;  %1131 = vmatpush.bf16.msrb.mxu3 %v1700_v58 }
 0x3a0   :  { %1093 = vmatpush.bf16.msrb.mxu0 %v1704_v1  ;;  %1106 = vmatpush.bf16.msrb.mxu1 %v1710_v6  ;;  %v844_v6 = vld [vmem:[#allocation2 + $0xb0] sm:$0xff] }
 0x3a1   :  { %1119 = vmatpush.bf16.msrb.mxu2 %v1718_v20  ;;  %1132 = vmatpush.bf16.msrb.mxu3 %v1712_v9 }
 0x3a4   :  { %1094 = vmatpush.bf16.msrb.mxu0 %v1716_v19  ;;  %1107 = vmatpush.bf16.msrb.mxu1 %v1722_v24 }
 0x3a5   :  { %1120 = vmatpush.bf16.msrb.mxu2 %v1730_v37  ;;  %1133 = vmatpush.bf16.msrb.mxu3 %v1724_v25 }
 0x3a8   :  { %1095 = vmatpush.bf16.msrb.mxu0 %v1728_v36  ;;  %1108 = vmatpush.bf16.msrb.mxu1 %v1734_v38 }
 0x3a9   :  { %1121 = vmatpush.bf16.msrb.mxu2 %v1742_v44  ;;  %1134 = vmatpush.bf16.msrb.mxu3 %v1736_v39 }
 0x407   :  { %v855_v8 = vpop.f32.mrf.mxu0  ;;  %v868_v12 = vpop.f32.mrf.mxu1 }
 0x408   :  { %v856_v16 = vadd.f32 %v855_v8, %v842_v3  ;;  %v869_v17 = vadd.f32 %v868_v12, %v843_v7 }
 0x40a   :  { %v1365_v21 = vmul.f32 -1.442695, %v856_v16  ;;  %v1366_v28 = vmul.f32 -1.442695, %v869_v17 }
 0x40c   :  { %1494 = vpow2.f32 %v1365_v21  ;;  %v966_v21 = vld [vmem:[#allocation2 + $0xd8] sm:$0xff] }
 0x40d   :  { %1496 = vpow2.f32 %v1366_v28 }
 0x40e   :  { %v881_v33 = vpop.f32.mrf.mxu2  ;;  %v894_v34 = vpop.f32.mrf.mxu3 }
 0x40f   :  { %v895_v41 = vadd.f32 %v894_v34, %v845_v32  ;;  %v857_v42 = vpop.f32.mrf.mxu0  ;;  %v870_v45 = vpop.f32.mrf.mxu1  ;;  %v882_v24 = vadd.f32 %v881_v33, %v844_v6 }
 0x411   :  { %v1367_v46 = vmul.f32 -1.442695, %v895_v41 }
 0x412   :  { %v1495_v53 = vpop.eup %1494 }
 0x413   :  { %v1497_v54 = vpop.eup %1496  ;;  %v901_v57 = vadd.f32 1.0, %v1495_v53  ;;  %1498 = vpow2.f32 %v1367_v46 }
 0x414   :  { %v920_v58 = vadd.f32 1.0, %v1497_v54 }
 0x415   :  { %1500 = vrcp.f32 %v901_v57  ;;  %v913_v44 = vand.u32 2147483648, %v901_v57  ;;  %v911_v35 = vand.u32 2147483647, %v901_v57  ;;  %vm907_vm14 = vweird.f32 %v901_v57 }
 0x416   :  { %1502 = vrcp.f32 %v920_v58  ;;  %v883_v1 = vpop.f32.mrf.mxu2  ;;  %v896_v2 = vpop.f32.mrf.mxu3  ;;  %v932_v4 = vand.u32 2147483648, %v920_v58  ;;  %v930_v14 = vand.u32 2147483647, %v920_v58  ;;  %vm926_vm15 = vweird.f32 %v920_v58 }
 0x417   :  { %v914_v49 = vor.u32 1.1754944e-38, %v913_v44  ;;  %vm912_vm2 = vcmp.eq.f32.partialorder %v911_v35, 8.507059e+37  ;;  %v965_v1 = vld [vmem:[#allocation2 + $0xd0] sm:$0xff] }
 0x418   :  { %v933_v52 = vor.u32 1.1754944e-38, %v932_v4  ;;  %vm931_vm3 = vcmp.eq.f32.partialorder %v930_v14, 8.507059e+37 }
 0x419   :  { %v1499_v9 = vpop.eup %1498 }
 0x41a   :  { %v940_v19 = vadd.f32 1.0, %v1499_v9 }
 0x41b   :  { %v1501_v20 = vpop.eup %1500 }
 0x41c   :  { %v1503_v25 = vpop.eup %1502  ;;  %v903_v36 = vmul.f32 %v1501_v20, %v901_v57  ;;  %1504 = vrcp.f32 %v940_v19  ;;  %vm908_vm12 = vweird.f32 %v1501_v20  ;;  %v952_v22 = vand.u32 2147483648, %v940_v19 }
 0x41d   :  { %v922_v37 = vmul.f32 %v1503_v25, %v920_v58  ;;  %1506 = vtanh.f32 %v882_v24  ;;  %vm927_vm13 = vweird.f32 %v1503_v25  ;;  %vm909_vm0 = vmor %vm907_vm14, %vm908_vm12  ;;  %vm946_vm5 = vweird.f32 %v940_v19 }
 0x41e   :  { %v904_v38 = vsub.f32 1.0, %v903_v36  ;;  %vm928_vm1 = vmor %vm926_vm15, %vm927_vm13  ;;  %v950_v30 = vand.u32 2147483647, %v940_v19  ;;  %v953_v40 = vor.u32 1.1754944e-38, %v952_v22 }
 0x41f   :  { %v923_v39 = vsub.f32 1.0, %v922_v37 }
 0x420   :  { %v905_v31 = vmul.f32 %v1501_v20, %v904_v38  ;;  %vm951_vm7 = vcmp.eq.f32.partialorder %v950_v30, 8.507059e+37 }
 0x421   :  { %v924_v29 = vmul.f32 %v1503_v25, %v923_v39 }
 0x422   :  { %v1505_v47 = vpop.eup %1504  ;;  %v906_v48 = vadd.f32 %v1501_v20, %v905_v31 }
 0x423   :  { %v925_v50 = vadd.f32 %v1503_v25, %v924_v29  ;;  %v942_v51 = vmul.f32 %v1505_v47, %v940_v19  ;;  %v1507_v56 = vpop.eup %1506  ;;  %vm947_vm4 = vweird.f32 %v1505_v47 }
 0x424   :  { %v910_v55 = vsel %vm909_vm0, %v1501_v20, %v906_v48  ;;  %vm948_vm6 = vmor %vm946_vm5, %vm947_vm4 }
 0x425   :  { %v915_v59 = vsel %vm912_vm2, %v914_v49, %v910_v55  ;;  %v929_v60 = vsel %vm928_vm1, %v1503_v25, %v925_v50  ;;  %v943_v61 = vsub.f32 1.0, %v942_v51 }
 0x426   :  { %v934_v62 = vsel %vm931_vm3, %v933_v52, %v929_v60  ;;  %v957_v63 = vmul.f32 %v1507_v56, %v915_v59 }
 0x427   :  { %v956_v13 = vmul.f32 %v934_v62, %v1953_v0  ;;  %v944_v11 = vmul.f32 %v1505_v47, %v943_v61  ;;  %v963_v0 = vld [vmem:[#allocation2 + $0xc0] sm:$0xff] }
 0x429   :  { %v1989_v15 = vadd.f32 %v957_v63, %v956_v13  ;;  %v945_v18 = vadd.f32 %v1505_v47, %v944_v11 }
 0x42b   :  { %1508 = vtanh.f32 %v1989_v15  ;;  %v949_v27 = vsel %vm948_vm6, %v1505_v47, %v945_v18 }
 0x42c   :  { %v954_v43 = vsel %vm951_vm7, %v953_v40, %v949_v27 }
 0x431   :  { %v1509_v26 = vpop.eup %1508 }
 0x432   :  { %v960_v23 = vmul.f32 %v1509_v26, %v954_v43 }
 0x434   :  { %v961_v10 = vpack.c.bf16 %v960_v23, %v960_v23 }
 0x436   :  { %975 = vmatmul.bf16.vlgmr.msra.gmra.mxu0 %v961_v10  ;;  %988 = vmatmul.bf16.vlgmr.msra.gmra.mxu1 %v961_v10 }
 0x437   :  { %1001 = vmatmul.bf16.vlgmr.msra.gmra.mxu2 %v961_v10  ;;  %1014 = vmatmul.bf16.vlgmr.msra.gmra.mxu3 %v961_v10  ;;  %v1085_v10 = vld [vmem:[#allocation2 + $0xe8] sm:$0xff] }
 0x4b3   :  { %v976_v3 = vpop.f32.mrf.mxu0  ;;  %v989_v7 = vpop.f32.mrf.mxu1 }
 0x4b4   :  { %v977_v8 = vadd.f32 %v976_v3, %v963_v0  ;;  %v990_v12 = vadd.f32 %v989_v7, %v964_v5 }
 0x4b6   :  { %v1368_v16 = vmul.f32 -1.442695, %v977_v8  ;;  %v1369_v17 = vmul.f32 -1.442695, %v990_v12 }
 0x4b8   :  { %1510 = vpow2.f32 %v1368_v16  ;;  %v1087_v16 = vld [vmem:[#allocation2 + $0xf8] sm:$0xff] }
 0x4b9   :  { %1512 = vpow2.f32 %v1369_v17 }
 0x4ba   :  { %v1002_v28 = vpop.f32.mrf.mxu2  ;;  %v1015_v32 = vpop.f32.mrf.mxu3 }
 0x4bb   :  { %v1016_v33 = vadd.f32 %v1015_v32, %v966_v21  ;;  %v978_v34 = vpop.f32.mrf.mxu0  ;;  %v991_v41 = vpop.f32.mrf.mxu1  ;;  %v1003_v19 = vadd.f32 %v1002_v28, %v965_v1 }
 0x4bd   :  { %v1370_v42 = vmul.f32 -1.442695, %v1016_v33 }
 0x4be   :  { %v1511_v45 = vpop.eup %1510 }
 0x4bf   :  { %v1513_v46 = vpop.eup %1512  ;;  %v1022_v53 = vadd.f32 1.0, %v1511_v45  ;;  %1514 = vpow2.f32 %v1370_v42 }
 0x4c0   :  { %v1041_v54 = vadd.f32 1.0, %v1513_v46 }
 0x4c1   :  { %1516 = vrcp.f32 %v1022_v53  ;;  %v1034_v38 = vand.u32 2147483648, %v1022_v53  ;;  %v1032_v4 = vand.u32 2147483647, %v1022_v53  ;;  %vm1028_vm10 = vweird.f32 %v1022_v53 }
 0x4c2   :  { %1518 = vrcp.f32 %v1041_v54  ;;  %v1004_v57 = vpop.f32.mrf.mxu2  ;;  %v1017_v58 = vpop.f32.mrf.mxu3  ;;  %v1053_v39 = vand.u32 2147483648, %v1041_v54  ;;  %v1051_v35 = vand.u32 2147483647, %v1041_v54  ;;  %vm1047_vm11 = vweird.f32 %v1041_v54 }
 0x4c3   :  { %v1035_v47 = vor.u32 1.1754944e-38, %v1034_v38  ;;  %vm1033_vm14 = vcmp.eq.f32.partialorder %v1032_v4, 8.507059e+37  ;;  %v1086_v57 = vld [vmem:[#allocation2 + $0xf0] sm:$0xff] }
 0x4c4   :  { %v1054_v50 = vor.u32 1.1754944e-38, %v1053_v39  ;;  %vm1052_vm15 = vcmp.eq.f32.partialorder %v1051_v35, 8.507059e+37 }
 0x4c5   :  { %v1515_v2 = vpop.eup %1514 }
 0x4c6   :  { %v1061_v6 = vadd.f32 1.0, %v1515_v2 }
 0x4c7   :  { %v1517_v9 = vpop.eup %1516 }
 0x4c8   :  { %v1519_v20 = vpop.eup %1518  ;;  %v1024_v24 = vmul.f32 %v1517_v9, %v1022_v53  ;;  %1520 = vrcp.f32 %v1061_v6  ;;  %vm1029_vm8 = vweird.f32 %v1517_v9  ;;  %v1073_v18 = vand.u32 2147483648, %v1061_v6 }
 0x4c9   :  { %v1043_v25 = vmul.f32 %v1519_v20, %v1041_v54  ;;  %1522 = vtanh.f32 %v1003_v19  ;;  %vm1048_vm9 = vweird.f32 %v1519_v20  ;;  %vm1030_vm12 = vmor %vm1028_vm10, %vm1029_vm8  ;;  %vm1067_vm1 = vweird.f32 %v1061_v6 }
 0x4ca   :  { %v1025_v36 = vsub.f32 1.0, %v1024_v24  ;;  %vm1049_vm13 = vmor %vm1047_vm11, %vm1048_vm9  ;;  %v1071_v22 = vand.u32 2147483647, %v1061_v6  ;;  %v1074_v27 = vor.u32 1.1754944e-38, %v1073_v18 }
 0x4cb   :  { %v1044_v37 = vsub.f32 1.0, %v1043_v25 }
 0x4cc   :  { %v1026_v44 = vmul.f32 %v1517_v9, %v1025_v36  ;;  %vm1072_vm3 = vcmp.eq.f32.partialorder %v1071_v22, 8.507059e+37 }
 0x4cd   :  { %v1045_v31 = vmul.f32 %v1519_v20, %v1044_v37 }
 0x4ce   :  { %v1521_v29 = vpop.eup %1520  ;;  %v1027_v14 = vadd.f32 %v1517_v9, %v1026_v44 }
 0x4cf   :  { %v1046_v48 = vadd.f32 %v1519_v20, %v1045_v31  ;;  %v1063_v49 = vmul.f32 %v1521_v29, %v1061_v6  ;;  %v1523_v52 = vpop.eup %1522  ;;  %vm1068_vm0 = vweird.f32 %v1521_v29 }
 0x4d0   :  { %v1031_v51 = vsel %vm1030_vm12, %v1517_v9, %v1027_v14  ;;  %vm1069_vm2 = vmor %vm1067_vm1, %vm1068_vm0 }
 0x4d1   :  { %v1036_v55 = vsel %vm1033_vm14, %v1035_v47, %v1031_v51  ;;  %v1050_v56 = vsel %vm1049_vm13, %v1519_v20, %v1046_v48  ;;  %v1064_v59 = vsub.f32 1.0, %v1063_v49 }
 0x4d2   :  { %v1055_v60 = vsel %vm1052_vm15, %v1054_v50, %v1050_v56  ;;  %v1078_v61 = vmul.f32 %v1523_v52, %v1036_v55 }
 0x4d3   :  { %v1077_v62 = vmul.f32 %v1055_v60, %v1989_v15  ;;  %v1065_v63 = vmul.f32 %v1521_v29, %v1064_v59  ;;  %v1084_v15 = vld [vmem:[#allocation2 + $0xe0] sm:$0xff] }
 0x4d5   :  { %v1993_v13 = vadd.f32 %v1078_v61, %v1077_v62  ;;  %v1066_v11 = vadd.f32 %v1521_v29, %v1065_v63 }
 0x4d7   :  { %1524 = vtanh.f32 %v1993_v13  ;;  %v1070_v30 = vsel %vm1069_vm2, %v1521_v29, %v1066_v11 }
 0x4d8   :  { %v1075_v26 = vsel %vm1072_vm3, %v1074_v27, %v1070_v30 }
 0x4dd   :  { %v1525_v40 = vpop.eup %1524 }
 0x4de   :  { %v1081_v43 = vmul.f32 %v1525_v40, %v1075_v26 }
 0x4e0   :  { %v1082_v23 = vpack.c.bf16 %v1081_v43, %v1081_v43 }
 0x4e2   :  { %1096 = vmatmul.bf16.vlgmr.msrb.gmra.mxu0 %v1082_v23  ;;  %1109 = vmatmul.bf16.vlgmr.msrb.gmra.mxu1 %v1082_v23 }
 0x4e3   :  { %1122 = vmatmul.bf16.vlgmr.msrb.gmra.mxu2 %v1082_v23  ;;  %1135 = vmatmul.bf16.vlgmr.msrb.gmra.mxu3 %v1082_v23 }
 0x55f   :  { %v1097_v0 = vpop.f32.mrf.mxu0  ;;  %v1110_v5 = vpop.f32.mrf.mxu1 }
 0x560   :  { %v1098_v3 = vadd.f32 %v1097_v0, %v1084_v15  ;;  %v1111_v7 = vadd.f32 %v1110_v5, %v1085_v10 }
 0x562   :  { %v1371_v8 = vmul.f32 -1.442695, %v1098_v3  ;;  %v1372_v12 = vmul.f32 -1.442695, %v1111_v7 }
 0x564   :  { %1526 = vpow2.f32 %v1371_v8 }
 0x565   :  { %1528 = vpow2.f32 %v1372_v12 }
 0x566   :  { %v1123_v17 = vpop.f32.mrf.mxu2  ;;  %v1136_v21 = vpop.f32.mrf.mxu3 }
 0x567   :  { %v1137_v28 = vadd.f32 %v1136_v21, %v1087_v16  ;;  %v1099_v32 = vpop.f32.mrf.mxu0  ;;  %v1112_v33 = vpop.f32.mrf.mxu1  ;;  %v1124_v6 = vadd.f32 %v1123_v17, %v1086_v57 }
 0x569   :  { %v1373_v34 = vmul.f32 -1.442695, %v1137_v28 }
 0x56a   :  { %v1527_v41 = vpop.eup %1526 }
 0x56b   :  { %v1529_v42 = vpop.eup %1528  ;;  %v1143_v45 = vadd.f32 1.0, %v1527_v41  ;;  %1530 = vpow2.f32 %v1373_v34 }
 0x56c   :  { %v1162_v46 = vadd.f32 1.0, %v1529_v42 }
 0x56d   :  { %1532 = vrcp.f32 %v1143_v45  ;;  %v1155_v36 = vand.u32 2147483648, %v1143_v45  ;;  %v1153_v39 = vand.u32 2147483647, %v1143_v45  ;;  %vm1149_vm6 = vweird.f32 %v1143_v45 }
 0x56e   :  { %1534 = vrcp.f32 %v1162_v46  ;;  %v1125_v53 = vpop.f32.mrf.mxu2  ;;  %v1138_v54 = vpop.f32.mrf.mxu3  ;;  %v1174_v37 = vand.u32 2147483648, %v1162_v46  ;;  %v1172_v4 = vand.u32 2147483647, %v1162_v46  ;;  %vm1168_vm7 = vweird.f32 %v1162_v46 }
 0x56f   :  { %v1156_v29 = vor.u32 1.1754944e-38, %v1155_v36  ;;  %vm1154_vm10 = vcmp.eq.f32.partialorder %v1153_v39, 8.507059e+37 }
 0x570   :  { %v1175_v48 = vor.u32 1.1754944e-38, %v1174_v37  ;;  %vm1173_vm11 = vcmp.eq.f32.partialorder %v1172_v4, 8.507059e+37 }
 0x571   :  { %v1531_v58 = vpop.eup %1530 }
 0x572   :  { %v1182_v1 = vadd.f32 1.0, %v1531_v58 }
 0x573   :  { %v1533_v2 = vpop.eup %1532 }
 0x574   :  { %v1535_v9 = vpop.eup %1534  ;;  %v1145_v19 = vmul.f32 %v1533_v2, %v1143_v45  ;;  %1536 = vrcp.f32 %v1182_v1  ;;  %vm1150_vm4 = vweird.f32 %v1533_v2  ;;  %v1194_v11 = vand.u32 2147483648, %v1182_v1 }
 0x575   :  { %v1164_v20 = vmul.f32 %v1535_v9, %v1162_v46  ;;  %1538 = vtanh.f32 %v1124_v6  ;;  %vm1169_vm5 = vweird.f32 %v1535_v9  ;;  %vm1151_vm8 = vmor %vm1149_vm6, %vm1150_vm4  ;;  %vm1188_vm13 = vweird.f32 %v1182_v1 }
 0x576   :  { %v1146_v24 = vsub.f32 1.0, %v1145_v19  ;;  %vm1170_vm9 = vmor %vm1168_vm7, %vm1169_vm5  ;;  %v1192_v18 = vand.u32 2147483647, %v1182_v1  ;;  %v1195_v30 = vor.u32 1.1754944e-38, %v1194_v11 }
 0x577   :  { %v1165_v25 = vsub.f32 1.0, %v1164_v20 }
 0x578   :  { %v1147_v38 = vmul.f32 %v1533_v2, %v1146_v24  ;;  %vm1193_vm15 = vcmp.eq.f32.partialorder %v1192_v18, 8.507059e+37 }
 0x579   :  { %v1166_v44 = vmul.f32 %v1535_v9, %v1165_v25 }
 0x57a   :  { %v1537_v31 = vpop.eup %1536  ;;  %v1148_v35 = vadd.f32 %v1533_v2, %v1147_v38 }
 0x57b   :  { %v1167_v14 = vadd.f32 %v1535_v9, %v1166_v44  ;;  %v1184_v47 = vmul.f32 %v1537_v31, %v1182_v1  ;;  %v1539_v50 = vpop.eup %1538  ;;  %vm1189_vm12 = vweird.f32 %v1537_v31 }
 0x57c   :  { %v1152_v49 = vsel %vm1151_vm8, %v1533_v2, %v1148_v35  ;;  %vm1190_vm14 = vmor %vm1188_vm13, %vm1189_vm12 }
 0x57d   :  { %v1157_v51 = vsel %vm1154_vm10, %v1156_v29, %v1152_v49  ;;  %v1171_v52 = vsel %vm1170_vm9, %v1535_v9, %v1167_v14  ;;  %v1185_v55 = vsub.f32 1.0, %v1184_v47 }
 0x57e   :  { %v1176_v56 = vsel %vm1173_vm11, %v1175_v48, %v1171_v52  ;;  %v1199_v59 = vmul.f32 %v1539_v50, %v1157_v51 }
 0x57f   :  { %v1198_v60 = vmul.f32 %v1176_v56, %v1993_v13  ;;  %v1186_v61 = vmul.f32 %v1537_v31, %v1185_v55 }
 0x581   :  { %v1200_v62 = vadd.f32 %v1199_v59, %v1198_v60  ;;  %v1187_v63 = vadd.f32 %v1537_v31, %v1186_v61 }
 0x583   :  { %1540 = vtanh.f32 %v1200_v62  ;;  %v1191_v22 = vsel %vm1190_vm14, %v1537_v31, %v1187_v63 }
 0x584   :  { %v1196_v13 = vsel %vm1193_vm15, %v1195_v30, %v1191_v22 }
 0x589   :  { %v1541_v27 = vpop.eup %1540 }
 0x58a   :  { %v1202_v40 = vmul.f32 %v1541_v27, %v1196_v13 }
 0x58c   :  { %1203 = vst [vmem:[#allocation7] sm:$0xff] %v1202_v40 }
 0x58d   :  { %1214 = dma.vmem_to_hbm [thread:$0]  %s1210_s1, 128, %s1212_s25, [#allocation4]  }
 0x58e   :  { %1618 = dma.done.wait [#allocation4], 128  }
 0x58f   :  { %1619 = vsyncadd [#allocation4], 4294967168 }
 0x590   :  { %1219 = vsyncpa [#allocation3], 1 }
 0x591   :  { %1220 = vsyncpa [#allocation6], 1 }
 0x592   :  { %1221 = vsyncpa [#allocation4], 1 }

</bundles_post_ra>
